<compile_context>
chip_gen: v7x
topology: tpu7x:2x2x1
jax: 0.10.0
libtpu: 0.0.40
codegen_flags: <defaults>
</compile_context>

<pallas_src>
import functools

import numpy as np

import jax
import jax.numpy as jnp
from jax import lax
from jax.experimental import pallas as pl
from jax.experimental.pallas import tpu as pltpu


def _round_up(x, m):
    return ((x + m - 1) // m) * m


def _rvq_kernel(x_ref, emb_ref, emb_lp_ref, e2_ref, q_ref, idx_ref, sq_ref, *,
                n_valid, tile_n, num_q, k_pad, d_pad, mask_rows, use_gather,
                transposed_idx, dist_precision):
    """One grid step: quantize `tile_n` rows through all `num_q` codebooks."""
    res = x_ref[...].astype(jnp.float32)             # (tile_n, Dp) residual (f32 carry)
    q_acc = jnp.zeros_like(res)                      # running sum of quantized vectors

    if mask_rows:
        row0 = pl.program_id(0) * tile_n
        rows = row0 + lax.broadcasted_iota(jnp.int32, (tile_n, 1), 0)
        row_ok = (rows < n_valid).astype(jnp.float32)   # (tile_n, 1) — tiny VPU cost

    col = lax.broadcasted_iota(jnp.int32, (tile_n, k_pad), 1)

    idx_cols, sq_vals = [], []
    for q in range(num_q):                           # static unroll (small Q)
        e_lp = emb_lp_ref[q]                         # (Kp, Dp) low-precision codebook
        e2 = e2_ref[q]                               # (1, Kp); padded rows hold 1e30

        # Distance up to a per-row constant (argmin-invariant): ||e||^2 - 2 x.e
        dots = lax.dot_general(
            res.astype(e_lp.dtype), e_lp, (((1,), (1,)), ((), ())),
            precision=dist_precision,
            preferred_element_type=jnp.float32)      # (tile_n, Kp), bf16 MXU pass
        dist = e2 - 2.0 * dots

        # First-minimal-index argmin (matches torch.argmin tie rule).
        min_d = jnp.min(dist, axis=1, keepdims=True)
        idx_col = jnp.min(jnp.where(dist <= min_d, col, k_pad),
                          axis=1, keepdims=True)     # (tile_n, 1) int32

        if use_gather:
            # Codeword-row gather from the resident f32 codebook: exact values,
            # no one-hot materialization, no extra MXU matmul.
            idx_b = jnp.broadcast_to(idx_col, (tile_n, d_pad))
            qv = jnp.take_along_axis(emb_ref[q], idx_b, axis=0,
                                     mode="promise_in_bounds")
        else:
            # Fallback: exact one-hot selection on the MXU.
            enc = (col == idx_col).astype(jnp.float32)
            qv = lax.dot_general(enc, emb_ref[q], (((1,), (0,)), ((), ())),
                                 precision=lax.Precision.HIGHEST,
                                 preferred_element_type=jnp.float32)

        diff = qv - res
        row_sq = jnp.sum(diff * diff, axis=1, keepdims=True)    # (tile_n, 1)
        if mask_rows:
            row_sq = row_sq * row_ok
        sq_vals.append(jnp.sum(row_sq, axis=0, keepdims=True))  # (1, 1)

        if transposed_idx:
            idx_ref[q, :] = idx_col[:, 0]            # lane-dense row store
        else:
            idx_cols.append(idx_col)

        q_acc = q_acc + qv
        res = res - qv                               # residual stays on-chip

    if not transposed_idx:
        idx_ref[...] = jnp.concatenate(idx_cols, axis=1)    # (tile_n, Q)
    q_ref[...] = q_acc.astype(q_ref.dtype)
    sq_ref[...] = jnp.concatenate(sq_vals, axis=1)[None]    # (1, 1, Q)


def _build_call(*, n_pad, d_pad, k_pad, num_q, num_tiles, tile_n, out_dtype,
                n_valid, use_gather, transposed_idx, single_buffer,
                dist_precision):
    kernel = functools.partial(
        _rvq_kernel, n_valid=n_valid, tile_n=tile_n, num_q=num_q, k_pad=k_pad,
        d_pad=d_pad, mask_rows=(n_pad != n_valid), use_gather=use_gather,
        transposed_idx=transposed_idx, dist_precision=dist_precision)

    # Resident (constant index_map) inputs: avoid a useless second pipeline buffer.
    resident = {"pipeline_mode": pl.Buffered(1)} if single_buffer else {}
    in_specs = [
        pl.BlockSpec((tile_n, d_pad), lambda i: (i, 0)),                    # activations
        pl.BlockSpec((num_q, k_pad, d_pad), lambda i: (0, 0, 0), **resident),  # f32 codebooks
        pl.BlockSpec((num_q, k_pad, d_pad), lambda i: (0, 0, 0), **resident),  # bf16 codebooks
        pl.BlockSpec((num_q, 1, k_pad), lambda i: (0, 0, 0), **resident),      # ||e||^2
    ]
    if transposed_idx:
        idx_spec = pl.BlockSpec((num_q, tile_n), lambda i: (0, i))
        idx_shape = jax.ShapeDtypeStruct((num_q, n_pad), jnp.int32)
    else:
        idx_spec = pl.BlockSpec((tile_n, num_q), lambda i: (i, 0))
        idx_shape = jax.ShapeDtypeStruct((n_pad, num_q), jnp.int32)

    return pl.pallas_call(
        kernel,
        grid=(num_tiles,),
        in_specs=in_specs,
        out_specs=(
            pl.BlockSpec((tile_n, d_pad), lambda i: (i, 0)),     # summed quantized
            idx_spec,                                            # argmin indices
            pl.BlockSpec((1, 1, num_q), lambda i: (i, 0, 0)),    # per-tile sq-err
        ),
        out_shape=(
            jax.ShapeDtypeStruct((n_pad, d_pad), out_dtype),
            idx_shape,
            jax.ShapeDtypeStruct((num_tiles, 1, num_q), jnp.float32),
        ),
        compiler_params=pltpu.CompilerParams(
            dimension_semantics=("parallel",),
            vmem_limit_bytes=32 * 1024 * 1024),
    )


# Configs from most to least aggressive; later ones only use constructs that are
# known to lower on every Mosaic version (safety net for older toolchains).
_CONFIGS = (
    dict(use_gather=True, transposed_idx=True, single_buffer=True),
    dict(use_gather=True, transposed_idx=True, single_buffer=False),
    dict(use_gather=False, transposed_idx=False, single_buffer=False),
)
_GOOD_CONFIG = {}


def recursive_vq_forward(inputs, embeddings, commitment_cost, *,
                         tile_n=512, distance_dtype=jnp.bfloat16):
    """RecursiveVectorQuantizerEMA.forward (detailed=False), eval-mode values.

    Returns (sum_losses, quantized_out, sum_perplexities, all_encodings), matching
    the PyTorch module (the straight-through estimator only affects gradients).
    Set distance_dtype=jnp.float32 to reproduce torch's f32 argmin tie behaviour.
    """
    if isinstance(embeddings, (list, tuple)):
        embeddings = jnp.stack(embeddings)
    emb = embeddings.astype(jnp.float32)             # (Q, K, D)
    num_q, K, D = emb.shape
    B, L, d_in = inputs.shape
    assert d_in == D
    N = B * L

    d_pad = _round_up(D, 128)                        # lane-dense activations / output
    k_pad = _round_up(K, 128)                        # lane-dense distances

    # Row tiling: lanes of the transposed index output need multiples of 128;
    # emit >=2 tiles whenever there is enough work (v7x has 2 TensorCores).
    if N >= 256:
        t = min(int(tile_n), _round_up(pl.cdiv(N, 2), 128))
        tile = max(128, (t // 128) * 128)
        n_pad = _round_up(N, tile)
    else:
        tile = _round_up(max(N, 8), 8)
        n_pad = tile
    num_tiles = n_pad // tile

    flat = inputs.reshape(N, D)                      # no dtype cast (kernel casts)
    if (n_pad, d_pad) != (N, D):
        flat = jnp.pad(flat, ((0, n_pad - N), (0, d_pad - D)))

    emb_pad = emb
    if (k_pad, d_pad) != (K, D):
        emb_pad = jnp.pad(emb, ((0, 0), (0, k_pad - K), (0, d_pad - D)))
    emb_lp = emb_pad.astype(distance_dtype)          # bf16 copy for the MXU
    e2 = jnp.sum(emb_pad * emb_pad, axis=-1)[:, None, :]       # (Q, 1, Kp)
    if k_pad != K:
        pad_mask = (jnp.arange(k_pad) >= K)[None, None, :]
        e2 = jnp.where(pad_mask, jnp.float32(1e30), e2)        # padded rows never win

    dist_precision = (lax.Precision.HIGHEST
                      if jnp.dtype(distance_dtype) == jnp.dtype(jnp.float32) else None)

    key = (n_pad, d_pad, k_pad, num_q, tile, num_tiles, str(jnp.dtype(distance_dtype)))
    start = _GOOD_CONFIG.get(key, 0)
    err = None
    for ci in range(start, len(_CONFIGS)):
        cfg = _CONFIGS[ci]
        try:
            call = _build_call(n_pad=n_pad, d_pad=d_pad, k_pad=k_pad, num_q=num_q,
                               num_tiles=num_tiles, tile_n=tile,
                               out_dtype=inputs.dtype, n_valid=N,
                               dist_precision=dist_precision, **cfg)
            q_pad, idx_raw, sq_part = jax.block_until_ready(
                call(flat, emb_pad, emb_lp, e2))
            _GOOD_CONFIG[key] = ci
            break
        except Exception as e:   # lowering-capability fallback to a safer config
            err = e
    else:
        raise err
    transposed_idx = _CONFIGS[ci]["transposed_idx"]

    idx = idx_raw[:, :N] if transposed_idx else idx_raw[:N, :].T     # (Q, N)
    q_flat = q_pad[:N, :D]
    sqerr = jnp.sum(sq_part, axis=(0, 1))                            # (Q,)

    losses = commitment_cost * sqerr / jnp.float32(N * D)            # per-layer loss
    # One-hots are a required module output; counts/perplexity come for free here.
    all_encodings = [jax.nn.one_hot(idx[q], K, dtype=jnp.float32)
                     for q in range(num_q)]
    counts = jnp.stack([jnp.sum(e, axis=0) for e in all_encodings])  # (Q, K)
    avg_probs = counts / jnp.float32(N)
    perps = jnp.exp(-jnp.sum(avg_probs * jnp.log(avg_probs + 1e-10), axis=-1))

    return (jnp.sum(losses), q_flat.reshape(B, L, D), jnp.sum(perps), all_encodings)


def _ref_forward(inputs, embeddings, commitment_cost, *, distance_dtype=jnp.bfloat16):
    """Pure-JAX reference mirroring the PyTorch forward (eval mode), using the
    same distance precision as the kernel so argmin ties are comparable."""
    emb = jnp.asarray(embeddings, jnp.float32)
    B, L, D = inputs.shape
    flat = inputs.reshape(-1, D).astype(jnp.float32)
    res, qout = flat, jnp.zeros_like(flat)
    tot_loss = jnp.float32(0.0)
    tot_perp = jnp.float32(0.0)
    prec = (lax.Precision.HIGHEST
            if jnp.dtype(distance_dtype) == jnp.dtype(jnp.float32) else None)
    encs = []
    for q in range(emb.shape[0]):
        e = emb[q]
        dots = jnp.matmul(res.astype(distance_dtype), e.astype(distance_dtype).T,
                          precision=prec, preferred_element_type=jnp.float32)
        dist = (jnp.sum(res ** 2, axis=1, keepdims=True)
                + jnp.sum(e ** 2, axis=1) - 2.0 * dots)
        i = jnp.argmin(dist, axis=1)
        qv = jnp.take(e, i, axis=0)
        enc = jax.nn.one_hot(i, e.shape[0], dtype=jnp.float32)
        tot_loss = tot_loss + commitment_cost * jnp.mean((qv - res) ** 2)
        p = jnp.mean(enc, axis=0)
        tot_perp = tot_perp + jnp.exp(-jnp.sum(p * jnp.log(p + 1e-10)))
        qout = qout + qv
        res = res - qv
        encs.append(enc)
    return tot_loss, qout.reshape(B, L, D), tot_perp, encs


if __name__ == "__main__":
    commitment_cost = 0.25
    root = jax.random.PRNGKey(0)

    def run_case(B, L, D, K, Q):
        k_in, k_emb = jax.random.split(jax.random.fold_in(root, B * 1000 + L))
        inputs = jax.random.normal(k_in, (B, L, D), jnp.float32)
        embeddings = jax.random.normal(k_emb, (Q, K, D), jnp.float32)

        out = recursive_vq_forward(inputs, embeddings, commitment_cost)
        loss, quantized, perplexity, encodings = jax.block_until_ready(out)

        assert quantized.shape == (B, L, D)
        assert len(encodings) == Q
        assert all(e.shape == (B * L, K) for e in encodings)

        r_loss, r_q, r_perp, r_enc = _ref_forward(inputs, embeddings, commitment_cost)
        np.testing.assert_allclose(np.asarray(quantized), np.asarray(r_q),
                                   rtol=1e-3, atol=1e-3)
        np.testing.assert_allclose(float(loss), float(r_loss), rtol=1e-3, atol=1e-5)
        np.testing.assert_allclose(float(perplexity), float(r_perp),
                                   rtol=1e-3, atol=1e-4)
        for e_k, e_r in zip(encodings, r_enc):
            np.testing.assert_allclose(np.asarray(e_k), np.asarray(e_r))

    # Small single-tile case, plus a multi-tile case exercising row masking,
    # the parallel grid axis and the transposed index layout.
    run_case(B=2, L=8, D=32, K=64, Q=3)
    run_case(B=4, L=96, D=32, K=64, Q=3)

    print("KERNEL_OK")
</pallas_src>

<mosaic_0001>
module attributes {stable_mosaic.version = 11 : i64} {
  func.func @_rvq_kernel(%arg0: i32, %arg1: memref<16x128xf32, #tpu.memory_space<vmem>>, %arg2: memref<3x128x128xf32, #tpu.memory_space<vmem>>, %arg3: memref<3x128x128xbf16, #tpu.memory_space<vmem>>, %arg4: memref<3x1x128xf32, #tpu.memory_space<vmem>>, %arg5: memref<16x128xf32, #tpu.memory_space<vmem>>, %arg6: memref<3x16xi32, #tpu.memory_space<vmem>>, %arg7: memref<1x1x3xf32, #tpu.memory_space<vmem>>) attributes {dimension_semantics = [#tpu.dimension_semantics<parallel>], iteration_bounds = array<i64: 1>, scalar_prefetch = 0 : i64, scratch_operands = 0 : i64, tpu.core_type = #tpu.core_type<tc>, window_params = [{transform_indices = @transform_0, window_bounds = array<i64: 16, 128>}, {pipeline_mode = #tpu.pipeline_mode<synchronous>, transform_indices = @transform_1, window_bounds = array<i64: 3, 128, 128>}, {pipeline_mode = #tpu.pipeline_mode<synchronous>, transform_indices = @transform_2, window_bounds = array<i64: 3, 128, 128>}, {pipeline_mode = #tpu.pipeline_mode<synchronous>, transform_indices = @transform_3, window_bounds = array<i64: 3, 1, 128>}, {transform_indices = @transform_4, window_bounds = array<i64: 16, 128>}, {transform_indices = @transform_5, window_bounds = array<i64: 3, 16>}, {transform_indices = @transform_6, window_bounds = array<i64: 1, 1, 3>}]} {
    %c0 = arith.constant 0 : index
    %c0_0 = arith.constant 0 : index
    %0 = vector.load %arg1[%c0, %c0_0] : memref<16x128xf32, #tpu.memory_space<vmem>>, vector<16x128xf32>
    %cst = arith.constant 0.000000e+00 : f32
    %1 = vector.broadcast %cst : f32 to vector<16x128xf32>
    %2 = tpu.iota {dimensions = array<i32: 1>} : vector<16x128xi32>
    %c0_1 = arith.constant 0 : index
    %c0_2 = arith.constant 0 : index
    %c0_3 = arith.constant 0 : index
    %3 = vector.load %arg3[%c0_1, %c0_2, %c0_3] : memref<3x128x128xbf16, #tpu.memory_space<vmem>>, vector<1x128x128xbf16>
    %4 = vector.shape_cast %3 : vector<1x128x128xbf16> to vector<128x128xbf16>
    %c0_4 = arith.constant 0 : index
    %c0_5 = arith.constant 0 : index
    %c0_6 = arith.constant 0 : index
    %5 = vector.load %arg4[%c0_4, %c0_5, %c0_6] : memref<3x1x128xf32, #tpu.memory_space<vmem>>, vector<1x1x128xf32>
    %6 = vector.shape_cast %5 : vector<1x1x128xf32> to vector<1x128xf32>
    %7 = arith.truncf %0 : vector<16x128xf32> to vector<16x128xbf16>
    %cst_7 = arith.constant dense<0.000000e+00> : vector<16x128xf32>
    %8 = tpu.matmul %7, %4, %cst_7 {dimension_numbers = #tpu.dot_dimension_numbers<[1], [1], [0], [0], [0, 0, 1, 0], [], []>} : vector<16x128xbf16>, vector<128x128xbf16>, vector<16x128xf32> -> vector<16x128xf32>
    %cst_8 = arith.constant 2.000000e+00 : f32
    %9 = vector.broadcast %cst_8 : f32 to vector<16x128xf32>
    %10 = arith.mulf %9, %8 : vector<16x128xf32>
    %11 = vector.broadcast %6 : vector<1x128xf32> to vector<16x128xf32>
    %12 = arith.subf %11, %10 : vector<16x128xf32>
    %cst_9 = arith.constant dense<0x7F800000> : vector<16xf32>
    %13 = vector.multi_reduction <minimumf>, %12, %cst_9 [1] : vector<16x128xf32> to vector<16xf32>
    %14 = vector.shape_cast %13 : vector<16xf32> to vector<16x1xf32>
    %15 = vector.broadcast %14 : vector<16x1xf32> to vector<16x128xf32>
    %16 = arith.cmpf ole, %12, %15 : vector<16x128xf32>
    %c128_i32 = arith.constant 128 : i32
    %17 = vector.broadcast %c128_i32 : i32 to vector<16x128xi32>
    %18 = arith.select %16, %2, %17 : vector<16x128xi1>, vector<16x128xi32>
    %cst_10 = arith.constant dense<2147483647> : vector<16xi32>
    %19 = vector.multi_reduction <minsi>, %18, %cst_10 [1] : vector<16x128xi32> to vector<16xi32>
    %20 = vector.shape_cast %19 : vector<16xi32> to vector<16x1xi32>
    %21 = vector.shape_cast %20 : vector<16x1xi32> to vector<16x1xi32>
    %22 = vector.broadcast %21 : vector<16x1xi32> to vector<16x128xi32>
    %c0_11 = arith.constant 0 : index
    %c0_12 = arith.constant 0 : index
    %c0_13 = arith.constant 0 : index
    %23 = vector.load %arg2[%c0_11, %c0_12, %c0_13] : memref<3x128x128xf32, #tpu.memory_space<vmem>>, vector<1x128x128xf32>
    %24 = vector.shape_cast %23 : vector<1x128x128xf32> to vector<128x128xf32>
    %25 = vector.shape_cast %22 : vector<16x128xi32> to vector<16x128x1xi32>
    %26 = vector.shape_cast %25 : vector<16x128x1xi32> to vector<16x128xi32>
    %27 = tpu.dynamic_gather %24[%26] in [0] : vector<128x128xf32>, vector<16x128xi32> -> vector<16x128xf32>
    %28 = arith.subf %27, %0 : vector<16x128xf32>
    %29 = arith.mulf %28, %28 : vector<16x128xf32>
    %cst_14 = arith.constant dense<0.000000e+00> : vector<16xf32>
    %30 = vector.multi_reduction <add>, %29, %cst_14 [1] : vector<16x128xf32> to vector<16xf32>
    %31 = vector.shape_cast %30 : vector<16xf32> to vector<16x1xf32>
    %cst_15 = arith.constant dense<0.000000e+00> : vector<1xf32>
    %32 = vector.multi_reduction <add>, %31, %cst_15 [0] : vector<16x1xf32> to vector<1xf32>
    %33 = vector.shape_cast %32 : vector<1xf32> to vector<1x1xf32>
    %34 = vector.shape_cast %20 : vector<16x1xi32> to vector<16xi32>
    %c0_16 = arith.constant 0 : index
    %c0_17 = arith.constant 0 : index
    %35 = vector.load %arg6[%c0_16, %c0_17] : memref<3x16xi32, #tpu.memory_space<vmem>>, vector<1x16xi32>
    %36 = vector.shape_cast %35 : vector<1x16xi32> to vector<16xi32>
    %37 = vector.shape_cast %34 : vector<16xi32> to vector<1x16xi32>
    tpu.vector_store %arg6[%c0_16, %c0_17], %37 {strides = array<i32>} : memref<3x16xi32, #tpu.memory_space<vmem>>, vector<1x16xi32>,
    %38 = arith.addf %1, %27 : vector<16x128xf32>
    %39 = arith.subf %0, %27 : vector<16x128xf32>
    %c1 = arith.constant 1 : index
    %c0_18 = arith.constant 0 : index
    %c0_19 = arith.constant 0 : index
    %40 = vector.load %arg3[%c1, %c0_18, %c0_19] : memref<3x128x128xbf16, #tpu.memory_space<vmem>>, vector<1x128x128xbf16>
    %41 = vector.shape_cast %40 : vector<1x128x128xbf16> to vector<128x128xbf16>
    %c1_20 = arith.constant 1 : index
    %c0_21 = arith.constant 0 : index
    %c0_22 = arith.constant 0 : index
    %42 = vector.load %arg4[%c1_20, %c0_21, %c0_22] : memref<3x1x128xf32, #tpu.memory_space<vmem>>, vector<1x1x128xf32>
    %43 = vector.shape_cast %42 : vector<1x1x128xf32> to vector<1x128xf32>
    %44 = arith.truncf %39 : vector<16x128xf32> to vector<16x128xbf16>
    %cst_23 = arith.constant dense<0.000000e+00> : vector<16x128xf32>
    %45 = tpu.matmul %44, %41, %cst_23 {dimension_numbers = #tpu.dot_dimension_numbers<[1], [1], [0], [0], [0, 0, 1, 0], [], []>} : vector<16x128xbf16>, vector<128x128xbf16>, vector<16x128xf32> -> vector<16x128xf32>
    %cst_24 = arith.constant 2.000000e+00 : f32
    %46 = vector.broadcast %cst_24 : f32 to vector<16x128xf32>
    %47 = arith.mulf %46, %45 : vector<16x128xf32>
    %48 = vector.broadcast %43 : vector<1x128xf32> to vector<16x128xf32>
    %49 = arith.subf %48, %47 : vector<16x128xf32>
    %cst_25 = arith.constant dense<0x7F800000> : vector<16xf32>
    %50 = vector.multi_reduction <minimumf>, %49, %cst_25 [1] : vector<16x128xf32> to vector<16xf32>
    %51 = vector.shape_cast %50 : vector<16xf32> to vector<16x1xf32>
    %52 = vector.broadcast %51 : vector<16x1xf32> to vector<16x128xf32>
    %53 = arith.cmpf ole, %49, %52 : vector<16x128xf32>
    %c128_i32_26 = arith.constant 128 : i32
    %54 = vector.broadcast %c128_i32_26 : i32 to vector<16x128xi32>
    %55 = arith.select %53, %2, %54 : vector<16x128xi1>, vector<16x128xi32>
    %cst_27 = arith.constant dense<2147483647> : vector<16xi32>
    %56 = vector.multi_reduction <minsi>, %55, %cst_27 [1] : vector<16x128xi32> to vector<16xi32>
    %57 = vector.shape_cast %56 : vector<16xi32> to vector<16x1xi32>
    %58 = vector.shape_cast %57 : vector<16x1xi32> to vector<16x1xi32>
    %59 = vector.broadcast %58 : vector<16x1xi32> to vector<16x128xi32>
    %c1_28 = arith.constant 1 : index
    %c0_29 = arith.constant 0 : index
    %c0_30 = arith.constant 0 : index
    %60 = vector.load %arg2[%c1_28, %c0_29, %c0_30] : memref<3x128x128xf32, #tpu.memory_space<vmem>>, vector<1x128x128xf32>
    %61 = vector.shape_cast %60 : vector<1x128x128xf32> to vector<128x128xf32>
    %62 = vector.shape_cast %59 : vector<16x128xi32> to vector<16x128x1xi32>
    %63 = vector.shape_cast %62 : vector<16x128x1xi32> to vector<16x128xi32>
    %64 = tpu.dynamic_gather %61[%63] in [0] : vector<128x128xf32>, vector<16x128xi32> -> vector<16x128xf32>
    %65 = arith.subf %64, %39 : vector<16x128xf32>
    %66 = arith.mulf %65, %65 : vector<16x128xf32>
    %cst_31 = arith.constant dense<0.000000e+00> : vector<16xf32>
    %67 = vector.multi_reduction <add>, %66, %cst_31 [1] : vector<16x128xf32> to vector<16xf32>
    %68 = vector.shape_cast %67 : vector<16xf32> to vector<16x1xf32>
    %cst_32 = arith.constant dense<0.000000e+00> : vector<1xf32>
    %69 = vector.multi_reduction <add>, %68, %cst_32 [0] : vector<16x1xf32> to vector<1xf32>
    %70 = vector.shape_cast %69 : vector<1xf32> to vector<1x1xf32>
    %71 = vector.shape_cast %57 : vector<16x1xi32> to vector<16xi32>
    %c1_33 = arith.constant 1 : index
    %c0_34 = arith.constant 0 : index
    %72 = vector.load %arg6[%c1_33, %c0_34] : memref<3x16xi32, #tpu.memory_space<vmem>>, vector<1x16xi32>
    %73 = vector.shape_cast %72 : vector<1x16xi32> to vector<16xi32>
    %74 = vector.shape_cast %71 : vector<16xi32> to vector<1x16xi32>
    tpu.vector_store %arg6[%c1_33, %c0_34], %74 {strides = array<i32>} : memref<3x16xi32, #tpu.memory_space<vmem>>, vector<1x16xi32>,
    %75 = arith.addf %38, %64 : vector<16x128xf32>
    %76 = arith.subf %39, %64 : vector<16x128xf32>
    %c2 = arith.constant 2 : index
    %c0_35 = arith.constant 0 : index
    %c0_36 = arith.constant 0 : index
    %77 = vector.load %arg3[%c2, %c0_35, %c0_36] : memref<3x128x128xbf16, #tpu.memory_space<vmem>>, vector<1x128x128xbf16>
    %78 = vector.shape_cast %77 : vector<1x128x128xbf16> to vector<128x128xbf16>
    %c2_37 = arith.constant 2 : index
    %c0_38 = arith.constant 0 : index
    %c0_39 = arith.constant 0 : index
    %79 = vector.load %arg4[%c2_37, %c0_38, %c0_39] : memref<3x1x128xf32, #tpu.memory_space<vmem>>, vector<1x1x128xf32>
    %80 = vector.shape_cast %79 : vector<1x1x128xf32> to vector<1x128xf32>
    %81 = arith.truncf %76 : vector<16x128xf32> to vector<16x128xbf16>
    %cst_40 = arith.constant dense<0.000000e+00> : vector<16x128xf32>
    %82 = tpu.matmul %81, %78, %cst_40 {dimension_numbers = #tpu.dot_dimension_numbers<[1], [1], [0], [0], [0, 0, 1, 0], [], []>} : vector<16x128xbf16>, vector<128x128xbf16>, vector<16x128xf32> -> vector<16x128xf32>
    %cst_41 = arith.constant 2.000000e+00 : f32
    %83 = vector.broadcast %cst_41 : f32 to vector<16x128xf32>
    %84 = arith.mulf %83, %82 : vector<16x128xf32>
    %85 = vector.broadcast %80 : vector<1x128xf32> to vector<16x128xf32>
    %86 = arith.subf %85, %84 : vector<16x128xf32>
    %cst_42 = arith.constant dense<0x7F800000> : vector<16xf32>
    %87 = vector.multi_reduction <minimumf>, %86, %cst_42 [1] : vector<16x128xf32> to vector<16xf32>
    %88 = vector.shape_cast %87 : vector<16xf32> to vector<16x1xf32>
    %89 = vector.broadcast %88 : vector<16x1xf32> to vector<16x128xf32>
    %90 = arith.cmpf ole, %86, %89 : vector<16x128xf32>
    %c128_i32_43 = arith.constant 128 : i32
    %91 = vector.broadcast %c128_i32_43 : i32 to vector<16x128xi32>
    %92 = arith.select %90, %2, %91 : vector<16x128xi1>, vector<16x128xi32>
    %cst_44 = arith.constant dense<2147483647> : vector<16xi32>
    %93 = vector.multi_reduction <minsi>, %92, %cst_44 [1] : vector<16x128xi32> to vector<16xi32>
    %94 = vector.shape_cast %93 : vector<16xi32> to vector<16x1xi32>
    %95 = vector.shape_cast %94 : vector<16x1xi32> to vector<16x1xi32>
    %96 = vector.broadcast %95 : vector<16x1xi32> to vector<16x128xi32>
    %c2_45 = arith.constant 2 : index
    %c0_46 = arith.constant 0 : index
    %c0_47 = arith.constant 0 : index
    %97 = vector.load %arg2[%c2_45, %c0_46, %c0_47] : memref<3x128x128xf32, #tpu.memory_space<vmem>>, vector<1x128x128xf32>
    %98 = vector.shape_cast %97 : vector<1x128x128xf32> to vector<128x128xf32>
    %99 = vector.shape_cast %96 : vector<16x128xi32> to vector<16x128x1xi32>
    %100 = vector.shape_cast %99 : vector<16x128x1xi32> to vector<16x128xi32>
    %101 = tpu.dynamic_gather %98[%100] in [0] : vector<128x128xf32>, vector<16x128xi32> -> vector<16x128xf32>
    %102 = arith.subf %101, %76 : vector<16x128xf32>
    %103 = arith.mulf %102, %102 : vector<16x128xf32>
    %cst_48 = arith.constant dense<0.000000e+00> : vector<16xf32>
    %104 = vector.multi_reduction <add>, %103, %cst_48 [1] : vector<16x128xf32> to vector<16xf32>
    %105 = vector.shape_cast %104 : vector<16xf32> to vector<16x1xf32>
    %cst_49 = arith.constant dense<0.000000e+00> : vector<1xf32>
    %106 = vector.multi_reduction <add>, %105, %cst_49 [0] : vector<16x1xf32> to vector<1xf32>
    %107 = vector.shape_cast %106 : vector<1xf32> to vector<1x1xf32>
    %108 = vector.shape_cast %94 : vector<16x1xi32> to vector<16xi32>
    %c2_50 = arith.constant 2 : index
    %c0_51 = arith.constant 0 : index
    %109 = vector.load %arg6[%c2_50, %c0_51] : memref<3x16xi32, #tpu.memory_space<vmem>>, vector<1x16xi32>
    %110 = vector.shape_cast %109 : vector<1x16xi32> to vector<16xi32>
    %111 = vector.shape_cast %108 : vector<16xi32> to vector<1x16xi32>
    tpu.vector_store %arg6[%c2_50, %c0_51], %111 {strides = array<i32>} : memref<3x16xi32, #tpu.memory_space<vmem>>, vector<1x16xi32>,
    %112 = arith.addf %75, %101 : vector<16x128xf32>
    %c0_52 = arith.constant 0 : index
    %c0_53 = arith.constant 0 : index
    %113 = vector.load %arg5[%c0_52, %c0_53] : memref<16x128xf32, #tpu.memory_space<vmem>>, vector<16x128xf32>
    tpu.vector_store %arg5[%c0_52, %c0_53], %112 {strides = array<i32>} : memref<16x128xf32, #tpu.memory_space<vmem>>, vector<16x128xf32>,
    %114 = tpu.concatenate %33, %70, %107 in 1 : vector<1x1xf32>, vector<1x1xf32>, vector<1x1xf32> -> vector<1x3xf32>
    %115 = vector.shape_cast %114 : vector<1x3xf32> to vector<1x1x3xf32>
    %c0_54 = arith.constant 0 : index
    %c0_55 = arith.constant 0 : index
    %c0_56 = arith.constant 0 : index
    %116 = vector.load %arg7[%c0_54, %c0_55, %c0_56] : memref<1x1x3xf32, #tpu.memory_space<vmem>>, vector<1x1x3xf32>
    tpu.vector_store %arg7[%c0_54, %c0_55, %c0_56], %115 {strides = array<i32>} : memref<1x1x3xf32, #tpu.memory_space<vmem>>, vector<1x1x3xf32>,
    return
  }
  func.func @transform_0(%arg0: i32) -> (i32, i32) {
    %c0_i32 = arith.constant 0 : i32
    %c0_i32_0 = arith.constant 0 : i32
    return %arg0, %c0_i32 : i32, i32
  }
  func.func @transform_1(%arg0: i32) -> (i32, i32, i32) {
    %c0_i32 = arith.constant 0 : i32
    %c0_i32_0 = arith.constant 0 : i32
    %c0_i32_1 = arith.constant 0 : i32
    %c0_i32_2 = arith.constant 0 : i32
    return %c0_i32, %c0_i32_0, %c0_i32_1 : i32, i32, i32
  }
  func.func @transform_2(%arg0: i32) -> (i32, i32, i32) {
    %c0_i32 = arith.constant 0 : i32
    %c0_i32_0 = arith.constant 0 : i32
    %c0_i32_1 = arith.constant 0 : i32
    %c0_i32_2 = arith.constant 0 : i32
    return %c0_i32, %c0_i32_0, %c0_i32_1 : i32, i32, i32
  }
  func.func @transform_3(%arg0: i32) -> (i32, i32, i32) {
    %c0_i32 = arith.constant 0 : i32
    %c0_i32_0 = arith.constant 0 : i32
    %c0_i32_1 = arith.constant 0 : i32
    %c0_i32_2 = arith.constant 0 : i32
    return %c0_i32, %c0_i32_0, %c0_i32_1 : i32, i32, i32
  }
  func.func @transform_4(%arg0: i32) -> (i32, i32) {
    %c0_i32 = arith.constant 0 : i32
    %c0_i32_0 = arith.constant 0 : i32
    return %arg0, %c0_i32 : i32, i32
  }
  func.func @transform_5(%arg0: i32) -> (i32, i32) {
    %c0_i32 = arith.constant 0 : i32
    %c0_i32_0 = arith.constant 0 : i32
    return %c0_i32, %arg0 : i32, i32
  }
  func.func @transform_6(%arg0: i32) -> (i32, i32, i32) {
    %c0_i32 = arith.constant 0 : i32
    %c0_i32_0 = arith.constant 0 : i32
    %c0_i32_1 = arith.constant 0 : i32
    return %arg0, %c0_i32, %c0_i32_0 : i32, i32, i32
  }
}

module attributes {stable_mosaic.version = 11 : i64} {
  func.func @_rvq_kernel(%arg0: i32, %arg1: memref<16x128xf32, #tpu.memory_space<vmem>>, %arg2: memref<3x128x128xf32, #tpu.memory_space<vmem>>, %arg3: memref<3x128x128xbf16, #tpu.memory_space<vmem>>, %arg4: memref<3x1x128xf32, #tpu.memory_space<vmem>>, %arg5: memref<16x128xf32, #tpu.memory_space<vmem>>, %arg6: memref<3x16xi32, #tpu.memory_space<vmem>>, %arg7: memref<1x1x3xf32, #tpu.memory_space<vmem>>) attributes {dimension_semantics = [#tpu.dimension_semantics<parallel>], iteration_bounds = array<i64: 1>, scalar_prefetch = 0 : i64, scratch_operands = 0 : i64, tpu.core_type = #tpu.core_type<tc>, window_params = [{transform_indices = @transform_0, window_bounds = array<i64: 16, 128>}, {pipeline_mode = #tpu.pipeline_mode<synchronous>, transform_indices = @transform_1, window_bounds = array<i64: 3, 128, 128>}, {pipeline_mode = #tpu.pipeline_mode<synchronous>, transform_indices = @transform_2, window_bounds = array<i64: 3, 128, 128>}, {pipeline_mode = #tpu.pipeline_mode<synchronous>, transform_indices = @transform_3, window_bounds = array<i64: 3, 1, 128>}, {transform_indices = @transform_4, window_bounds = array<i64: 16, 128>}, {transform_indices = @transform_5, window_bounds = array<i64: 3, 16>}, {transform_indices = @transform_6, window_bounds = array<i64: 1, 1, 3>}]} {
    %c0 = arith.constant 0 : index
    %c0_0 = arith.constant 0 : index
    %0 = vector.load %arg1[%c0, %c0_0] : memref<16x128xf32, #tpu.memory_space<vmem>>, vector<16x128xf32>
    %cst = arith.constant 0.000000e+00 : f32
    %1 = vector.broadcast %cst : f32 to vector<16x128xf32>
    %2 = tpu.iota {dimensions = array<i32: 1>} : vector<16x128xi32>
    %c0_1 = arith.constant 0 : index
    %c0_2 = arith.constant 0 : index
    %c0_3 = arith.constant 0 : index
    %3 = vector.load %arg3[%c0_1, %c0_2, %c0_3] : memref<3x128x128xbf16, #tpu.memory_space<vmem>>, vector<1x128x128xbf16>
    %4 = vector.shape_cast %3 : vector<1x128x128xbf16> to vector<128x128xbf16>
    %c0_4 = arith.constant 0 : index
    %c0_5 = arith.constant 0 : index
    %c0_6 = arith.constant 0 : index
    %5 = vector.load %arg4[%c0_4, %c0_5, %c0_6] : memref<3x1x128xf32, #tpu.memory_space<vmem>>, vector<1x1x128xf32>
    %6 = vector.shape_cast %5 : vector<1x1x128xf32> to vector<1x128xf32>
    %7 = arith.truncf %0 : vector<16x128xf32> to vector<16x128xbf16>
    %cst_7 = arith.constant dense<0.000000e+00> : vector<16x128xf32>
    %8 = tpu.matmul %7, %4, %cst_7 {dimension_numbers = #tpu.dot_dimension_numbers<[1], [1], [0], [0], [0, 0, 1, 0], [], []>} : vector<16x128xbf16>, vector<128x128xbf16>, vector<16x128xf32> -> vector<16x128xf32>
    %cst_8 = arith.constant 2.000000e+00 : f32
    %9 = vector.broadcast %cst_8 : f32 to vector<16x128xf32>
    %10 = arith.mulf %9, %8 : vector<16x128xf32>
    %11 = vector.broadcast %6 : vector<1x128xf32> to vector<16x128xf32>
    %12 = arith.subf %11, %10 : vector<16x128xf32>
    %cst_9 = arith.constant dense<0x7F800000> : vector<16xf32>
    %13 = vector.multi_reduction <minimumf>, %12, %cst_9 [1] : vector<16x128xf32> to vector<16xf32>
    %14 = vector.shape_cast %13 : vector<16xf32> to vector<16x1xf32>
    %15 = vector.broadcast %14 : vector<16x1xf32> to vector<16x128xf32>
    %16 = arith.cmpf ole, %12, %15 : vector<16x128xf32>
    %c128_i32 = arith.constant 128 : i32
    %17 = vector.broadcast %c128_i32 : i32 to vector<16x128xi32>
    %18 = arith.select %16, %2, %17 : vector<16x128xi1>, vector<16x128xi32>
    %cst_10 = arith.constant dense<2147483647> : vector<16xi32>
    %19 = vector.multi_reduction <minsi>, %18, %cst_10 [1] : vector<16x128xi32> to vector<16xi32>
    %20 = vector.shape_cast %19 : vector<16xi32> to vector<16x1xi32>
    %21 = vector.shape_cast %20 : vector<16x1xi32> to vector<16x1xi32>
    %22 = vector.broadcast %21 : vector<16x1xi32> to vector<16x128xi32>
    %c0_11 = arith.constant 0 : index
    %c0_12 = arith.constant 0 : index
    %c0_13 = arith.constant 0 : index
    %23 = vector.load %arg2[%c0_11, %c0_12, %c0_13] : memref<3x128x128xf32, #tpu.memory_space<vmem>>, vector<1x128x128xf32>
    %24 = vector.shape_cast %23 : vector<1x128x128xf32> to vector<128x128xf32>
    %25 = vector.shape_cast %22 : vector<16x128xi32> to vector<16x128x1xi32>
    %26 = vector.shape_cast %25 : vector<16x128x1xi32> to vector<16x128xi32>
    %27 = tpu.dynamic_gather %24[%26] in [0] : vector<128x128xf32>, vector<16x128xi32> -> vector<16x128xf32>
    %28 = arith.subf %27, %0 : vector<16x128xf32>
    %29 = arith.mulf %28, %28 : vector<16x128xf32>
    %cst_14 = arith.constant dense<0.000000e+00> : vector<16xf32>
    %30 = vector.multi_reduction <add>, %29, %cst_14 [1] : vector<16x128xf32> to vector<16xf32>
    %31 = vector.shape_cast %30 : vector<16xf32> to vector<16x1xf32>
    %cst_15 = arith.constant dense<0.000000e+00> : vector<1xf32>
    %32 = vector.multi_reduction <add>, %31, %cst_15 [0] : vector<16x1xf32> to vector<1xf32>
    %33 = vector.shape_cast %32 : vector<1xf32> to vector<1x1xf32>
    %34 = vector.shape_cast %20 : vector<16x1xi32> to vector<16xi32>
    %c0_16 = arith.constant 0 : index
    %c0_17 = arith.constant 0 : index
    %35 = vector.load %arg6[%c0_16, %c0_17] : memref<3x16xi32, #tpu.memory_space<vmem>>, vector<1x16xi32>
    %36 = vector.shape_cast %35 : vector<1x16xi32> to vector<16xi32>
    %37 = vector.shape_cast %34 : vector<16xi32> to vector<1x16xi32>
    tpu.vector_store %arg6[%c0_16, %c0_17], %37 {strides = array<i32>} : memref<3x16xi32, #tpu.memory_space<vmem>>, vector<1x16xi32>,
    %38 = arith.addf %1, %27 : vector<16x128xf32>
    %39 = arith.subf %0, %27 : vector<16x128xf32>
    %c1 = arith.constant 1 : index
    %c0_18 = arith.constant 0 : index
    %c0_19 = arith.constant 0 : index
    %40 = vector.load %arg3[%c1, %c0_18, %c0_19] : memref<3x128x128xbf16, #tpu.memory_space<vmem>>, vector<1x128x128xbf16>
    %41 = vector.shape_cast %40 : vector<1x128x128xbf16> to vector<128x128xbf16>
    %c1_20 = arith.constant 1 : index
    %c0_21 = arith.constant 0 : index
    %c0_22 = arith.constant 0 : index
    %42 = vector.load %arg4[%c1_20, %c0_21, %c0_22] : memref<3x1x128xf32, #tpu.memory_space<vmem>>, vector<1x1x128xf32>
    %43 = vector.shape_cast %42 : vector<1x1x128xf32> to vector<1x128xf32>
    %44 = arith.truncf %39 : vector<16x128xf32> to vector<16x128xbf16>
    %cst_23 = arith.constant dense<0.000000e+00> : vector<16x128xf32>
    %45 = tpu.matmul %44, %41, %cst_23 {dimension_numbers = #tpu.dot_dimension_numbers<[1], [1], [0], [0], [0, 0, 1, 0], [], []>} : vector<16x128xbf16>, vector<128x128xbf16>, vector<16x128xf32> -> vector<16x128xf32>
    %cst_24 = arith.constant 2.000000e+00 : f32
    %46 = vector.broadcast %cst_24 : f32 to vector<16x128xf32>
    %47 = arith.mulf %46, %45 : vector<16x128xf32>
    %48 = vector.broadcast %43 : vector<1x128xf32> to vector<16x128xf32>
    %49 = arith.subf %48, %47 : vector<16x128xf32>
    %cst_25 = arith.constant dense<0x7F800000> : vector<16xf32>
    %50 = vector.multi_reduction <minimumf>, %49, %cst_25 [1] : vector<16x128xf32> to vector<16xf32>
    %51 = vector.shape_cast %50 : vector<16xf32> to vector<16x1xf32>
    %52 = vector.broadcast %51 : vector<16x1xf32> to vector<16x128xf32>
    %53 = arith.cmpf ole, %49, %52 : vector<16x128xf32>
    %c128_i32_26 = arith.constant 128 : i32
    %54 = vector.broadcast %c128_i32_26 : i32 to vector<16x128xi32>
    %55 = arith.select %53, %2, %54 : vector<16x128xi1>, vector<16x128xi32>
    %cst_27 = arith.constant dense<2147483647> : vector<16xi32>
    %56 = vector.multi_reduction <minsi>, %55, %cst_27 [1] : vector<16x128xi32> to vector<16xi32>
    %57 = vector.shape_cast %56 : vector<16xi32> to vector<16x1xi32>
    %58 = vector.shape_cast %57 : vector<16x1xi32> to vector<16x1xi32>
    %59 = vector.broadcast %58 : vector<16x1xi32> to vector<16x128xi32>
    %c1_28 = arith.constant 1 : index
    %c0_29 = arith.constant 0 : index
    %c0_30 = arith.constant 0 : index
    %60 = vector.load %arg2[%c1_28, %c0_29, %c0_30] : memref<3x128x128xf32, #tpu.memory_space<vmem>>, vector<1x128x128xf32>
    %61 = vector.shape_cast %60 : vector<1x128x128xf32> to vector<128x128xf32>
    %62 = vector.shape_cast %59 : vector<16x128xi32> to vector<16x128x1xi32>
    %63 = vector.shape_cast %62 : vector<16x128x1xi32> to vector<16x128xi32>
    %64 = tpu.dynamic_gather %61[%63] in [0] : vector<128x128xf32>, vector<16x128xi32> -> vector<16x128xf32>
    %65 = arith.subf %64, %39 : vector<16x128xf32>
    %66 = arith.mulf %65, %65 : vector<16x128xf32>
    %cst_31 = arith.constant dense<0.000000e+00> : vector<16xf32>
    %67 = vector.multi_reduction <add>, %66, %cst_31 [1] : vector<16x128xf32> to vector<16xf32>
    %68 = vector.shape_cast %67 : vector<16xf32> to vector<16x1xf32>
    %cst_32 = arith.constant dense<0.000000e+00> : vector<1xf32>
    %69 = vector.multi_reduction <add>, %68, %cst_32 [0] : vector<16x1xf32> to vector<1xf32>
    %70 = vector.shape_cast %69 : vector<1xf32> to vector<1x1xf32>
    %71 = vector.shape_cast %57 : vector<16x1xi32> to vector<16xi32>
    %c1_33 = arith.constant 1 : index
    %c0_34 = arith.constant 0 : index
    %72 = vector.load %arg6[%c1_33, %c0_34] : memref<3x16xi32, #tpu.memory_space<vmem>>, vector<1x16xi32>
    %73 = vector.shape_cast %72 : vector<1x16xi32> to vector<16xi32>
    %74 = vector.shape_cast %71 : vector<16xi32> to vector<1x16xi32>
    tpu.vector_store %arg6[%c1_33, %c0_34], %74 {strides = array<i32>} : memref<3x16xi32, #tpu.memory_space<vmem>>, vector<1x16xi32>,
    %75 = arith.addf %38, %64 : vector<16x128xf32>
    %76 = arith.subf %39, %64 : vector<16x128xf32>
    %c2 = arith.constant 2 : index
    %c0_35 = arith.constant 0 : index
    %c0_36 = arith.constant 0 : index
    %77 = vector.load %arg3[%c2, %c0_35, %c0_36] : memref<3x128x128xbf16, #tpu.memory_space<vmem>>, vector<1x128x128xbf16>
    %78 = vector.shape_cast %77 : vector<1x128x128xbf16> to vector<128x128xbf16>
    %c2_37 = arith.constant 2 : index
    %c0_38 = arith.constant 0 : index
    %c0_39 = arith.constant 0 : index
    %79 = vector.load %arg4[%c2_37, %c0_38, %c0_39] : memref<3x1x128xf32, #tpu.memory_space<vmem>>, vector<1x1x128xf32>
    %80 = vector.shape_cast %79 : vector<1x1x128xf32> to vector<1x128xf32>
    %81 = arith.truncf %76 : vector<16x128xf32> to vector<16x128xbf16>
    %cst_40 = arith.constant dense<0.000000e+00> : vector<16x128xf32>
    %82 = tpu.matmul %81, %78, %cst_40 {dimension_numbers = #tpu.dot_dimension_numbers<[1], [1], [0], [0], [0, 0, 1, 0], [], []>} : vector<16x128xbf16>, vector<128x128xbf16>, vector<16x128xf32> -> vector<16x128xf32>
    %cst_41 = arith.constant 2.000000e+00 : f32
    %83 = vector.broadcast %cst_41 : f32 to vector<16x128xf32>
    %84 = arith.mulf %83, %82 : vector<16x128xf32>
    %85 = vector.broadcast %80 : vector<1x128xf32> to vector<16x128xf32>
    %86 = arith.subf %85, %84 : vector<16x128xf32>
    %cst_42 = arith.constant dense<0x7F800000> : vector<16xf32>
    %87 = vector.multi_reduction <minimumf>, %86, %cst_42 [1] : vector<16x128xf32> to vector<16xf32>
    %88 = vector.shape_cast %87 : vector<16xf32> to vector<16x1xf32>
    %89 = vector.broadcast %88 : vector<16x1xf32> to vector<16x128xf32>
    %90 = arith.cmpf ole, %86, %89 : vector<16x128xf32>
    %c128_i32_43 = arith.constant 128 : i32
    %91 = vector.broadcast %c128_i32_43 : i32 to vector<16x128xi32>
    %92 = arith.select %90, %2, %91 : vector<16x128xi1>, vector<16x128xi32>
    %cst_44 = arith.constant dense<2147483647> : vector<16xi32>
    %93 = vector.multi_reduction <minsi>, %92, %cst_44 [1] : vector<16x128xi32> to vector<16xi32>
    %94 = vector.shape_cast %93 : vector<16xi32> to vector<16x1xi32>
    %95 = vector.shape_cast %94 : vector<16x1xi32> to vector<16x1xi32>
    %96 = vector.broadcast %95 : vector<16x1xi32> to vector<16x128xi32>
    %c2_45 = arith.constant 2 : index
    %c0_46 = arith.constant 0 : index
    %c0_47 = arith.constant 0 : index
    %97 = vector.load %arg2[%c2_45, %c0_46, %c0_47] : memref<3x128x128xf32, #tpu.memory_space<vmem>>, vector<1x128x128xf32>
    %98 = vector.shape_cast %97 : vector<1x128x128xf32> to vector<128x128xf32>
    %99 = vector.shape_cast %96 : vector<16x128xi32> to vector<16x128x1xi32>
    %100 = vector.shape_cast %99 : vector<16x128x1xi32> to vector<16x128xi32>
    %101 = tpu.dynamic_gather %98[%100] in [0] : vector<128x128xf32>, vector<16x128xi32> -> vector<16x128xf32>
    %102 = arith.subf %101, %76 : vector<16x128xf32>
    %103 = arith.mulf %102, %102 : vector<16x128xf32>
    %cst_48 = arith.constant dense<0.000000e+00> : vector<16xf32>
    %104 = vector.multi_reduction <add>, %103, %cst_48 [1] : vector<16x128xf32> to vector<16xf32>
    %105 = vector.shape_cast %104 : vector<16xf32> to vector<16x1xf32>
    %cst_49 = arith.constant dense<0.000000e+00> : vector<1xf32>
    %106 = vector.multi_reduction <add>, %105, %cst_49 [0] : vector<16x1xf32> to vector<1xf32>
    %107 = vector.shape_cast %106 : vector<1xf32> to vector<1x1xf32>
    %108 = vector.shape_cast %94 : vector<16x1xi32> to vector<16xi32>
    %c2_50 = arith.constant 2 : index
    %c0_51 = arith.constant 0 : index
    %109 = vector.load %arg6[%c2_50, %c0_51] : memref<3x16xi32, #tpu.memory_space<vmem>>, vector<1x16xi32>
    %110 = vector.shape_cast %109 : vector<1x16xi32> to vector<16xi32>
    %111 = vector.shape_cast %108 : vector<16xi32> to vector<1x16xi32>
    tpu.vector_store %arg6[%c2_50, %c0_51], %111 {strides = array<i32>} : memref<3x16xi32, #tpu.memory_space<vmem>>, vector<1x16xi32>,
    %112 = arith.addf %75, %101 : vector<16x128xf32>
    %c0_52 = arith.constant 0 : index
    %c0_53 = arith.constant 0 : index
    %113 = vector.load %arg5[%c0_52, %c0_53] : memref<16x128xf32, #tpu.memory_space<vmem>>, vector<16x128xf32>
    tpu.vector_store %arg5[%c0_52, %c0_53], %112 {strides = array<i32>} : memref<16x128xf32, #tpu.memory_space<vmem>>, vector<16x128xf32>,
    %114 = tpu.concatenate %33, %70, %107 in 1 : vector<1x1xf32>, vector<1x1xf32>, vector<1x1xf32> -> vector<1x3xf32>
    %115 = vector.shape_cast %114 : vector<1x3xf32> to vector<1x1x3xf32>
    %c0_54 = arith.constant 0 : index
    %c0_55 = arith.constant 0 : index
    %c0_56 = arith.constant 0 : index
    %116 = vector.load %arg7[%c0_54, %c0_55, %c0_56] : memref<1x1x3xf32, #tpu.memory_space<vmem>>, vector<1x1x3xf32>
    tpu.vector_store %arg7[%c0_54, %c0_55, %c0_56], %115 {strides = array<i32>} : memref<1x1x3xf32, #tpu.memory_space<vmem>>, vector<1x1x3xf32>,
    return
  }
  func.func @transform_0(%arg0: i32) -> (i32, i32) {
    %c0_i32 = arith.constant 0 : i32
    %c0_i32_0 = arith.constant 0 : i32
    return %arg0, %c0_i32 : i32, i32
  }
  func.func @transform_1(%arg0: i32) -> (i32, i32, i32) {
    %c0_i32 = arith.constant 0 : i32
    %c0_i32_0 = arith.constant 0 : i32
    %c0_i32_1 = arith.constant 0 : i32
    %c0_i32_2 = arith.constant 0 : i32
    return %c0_i32, %c0_i32_0, %c0_i32_1 : i32, i32, i32
  }
  func.func @transform_2(%arg0: i32) -> (i32, i32, i32) {
    %c0_i32 = arith.constant 0 : i32
    %c0_i32_0 = arith.constant 0 : i32
    %c0_i32_1 = arith.constant 0 : i32
    %c0_i32_2 = arith.constant 0 : i32
    return %c0_i32, %c0_i32_0, %c0_i32_1 : i32, i32, i32
  }
  func.func @transform_3(%arg0: i32) -> (i32, i32, i32) {
    %c0_i32 = arith.constant 0 : i32
    %c0_i32_0 = arith.constant 0 : i32
    %c0_i32_1 = arith.constant 0 : i32
    %c0_i32_2 = arith.constant 0 : i32
    return %c0_i32, %c0_i32_0, %c0_i32_1 : i32, i32, i32
  }
  func.func @transform_4(%arg0: i32) -> (i32, i32) {
    %c0_i32 = arith.constant 0 : i32
    %c0_i32_0 = arith.constant 0 : i32
    return %arg0, %c0_i32 : i32, i32
  }
  func.func @transform_5(%arg0: i32) -> (i32, i32) {
    %c0_i32 = arith.constant 0 : i32
    %c0_i32_0 = arith.constant 0 : i32
    return %c0_i32, %arg0 : i32, i32
  }
  func.func @transform_6(%arg0: i32) -> (i32, i32, i32) {
    %c0_i32 = arith.constant 0 : i32
    %c0_i32_0 = arith.constant 0 : i32
    %c0_i32_1 = arith.constant 0 : i32
    return %arg0, %c0_i32, %c0_i32_0 : i32, i32, i32
  }
}

module attributes {stable_mosaic.version = 11 : i64} {
  func.func @_rvq_kernel(%arg0: i32, %arg1: memref<16x128xf32, #tpu.memory_space<vmem>>, %arg2: memref<3x128x128xf32, #tpu.memory_space<vmem>>, %arg3: memref<3x128x128xbf16, #tpu.memory_space<vmem>>, %arg4: memref<3x1x128xf32, #tpu.memory_space<vmem>>, %arg5: memref<16x128xf32, #tpu.memory_space<vmem>>, %arg6: memref<16x3xi32, #tpu.memory_space<vmem>>, %arg7: memref<1x1x3xf32, #tpu.memory_space<vmem>>) attributes {dimension_semantics = [#tpu.dimension_semantics<parallel>], iteration_bounds = array<i64: 1>, scalar_prefetch = 0 : i64, scratch_operands = 0 : i64, tpu.core_type = #tpu.core_type<tc>, window_params = [{transform_indices = @transform_0, window_bounds = array<i64: 16, 128>}, {pipeline_mode = #tpu.pipeline_mode<synchronous>, transform_indices = @transform_1, window_bounds = array<i64: 3, 128, 128>}, {pipeline_mode = #tpu.pipeline_mode<synchronous>, transform_indices = @transform_2, window_bounds = array<i64: 3, 128, 128>}, {pipeline_mode = #tpu.pipeline_mode<synchronous>, transform_indices = @transform_3, window_bounds = array<i64: 3, 1, 128>}, {transform_indices = @transform_4, window_bounds = array<i64: 16, 128>}, {transform_indices = @transform_5, window_bounds = array<i64: 16, 3>}, {transform_indices = @transform_6, window_bounds = array<i64: 1, 1, 3>}]} {
    %c0 = arith.constant 0 : index
    %c0_0 = arith.constant 0 : index
    %0 = vector.load %arg1[%c0, %c0_0] : memref<16x128xf32, #tpu.memory_space<vmem>>, vector<16x128xf32>
    %cst = arith.constant 0.000000e+00 : f32
    %1 = vector.broadcast %cst : f32 to vector<16x128xf32>
    %2 = tpu.iota {dimensions = array<i32: 1>} : vector<16x128xi32>
    %c0_1 = arith.constant 0 : index
    %c0_2 = arith.constant 0 : index
    %c0_3 = arith.constant 0 : index
    %3 = vector.load %arg3[%c0_1, %c0_2, %c0_3] : memref<3x128x128xbf16, #tpu.memory_space<vmem>>, vector<1x128x128xbf16>
    %4 = vector.shape_cast %3 : vector<1x128x128xbf16> to vector<128x128xbf16>
    %c0_4 = arith.constant 0 : index
    %c0_5 = arith.constant 0 : index
    %c0_6 = arith.constant 0 : index
    %5 = vector.load %arg4[%c0_4, %c0_5, %c0_6] : memref<3x1x128xf32, #tpu.memory_space<vmem>>, vector<1x1x128xf32>
    %6 = vector.shape_cast %5 : vector<1x1x128xf32> to vector<1x128xf32>
    %7 = arith.truncf %0 : vector<16x128xf32> to vector<16x128xbf16>
    %cst_7 = arith.constant dense<0.000000e+00> : vector<16x128xf32>
    %8 = tpu.matmul %7, %4, %cst_7 {dimension_numbers = #tpu.dot_dimension_numbers<[1], [1], [0], [0], [0, 0, 1, 0], [], []>} : vector<16x128xbf16>, vector<128x128xbf16>, vector<16x128xf32> -> vector<16x128xf32>
    %cst_8 = arith.constant 2.000000e+00 : f32
    %9 = vector.broadcast %cst_8 : f32 to vector<16x128xf32>
    %10 = arith.mulf %9, %8 : vector<16x128xf32>
    %11 = vector.broadcast %6 : vector<1x128xf32> to vector<16x128xf32>
    %12 = arith.subf %11, %10 : vector<16x128xf32>
    %cst_9 = arith.constant dense<0x7F800000> : vector<16xf32>
    %13 = vector.multi_reduction <minimumf>, %12, %cst_9 [1] : vector<16x128xf32> to vector<16xf32>
    %14 = vector.shape_cast %13 : vector<16xf32> to vector<16x1xf32>
    %15 = vector.broadcast %14 : vector<16x1xf32> to vector<16x128xf32>
    %16 = arith.cmpf ole, %12, %15 : vector<16x128xf32>
    %c128_i32 = arith.constant 128 : i32
    %17 = vector.broadcast %c128_i32 : i32 to vector<16x128xi32>
    %18 = arith.select %16, %2, %17 : vector<16x128xi1>, vector<16x128xi32>
    %cst_10 = arith.constant dense<2147483647> : vector<16xi32>
    %19 = vector.multi_reduction <minsi>, %18, %cst_10 [1] : vector<16x128xi32> to vector<16xi32>
    %20 = vector.shape_cast %19 : vector<16xi32> to vector<16x1xi32>
    %21 = vector.broadcast %20 : vector<16x1xi32> to vector<16x128xi32>
    %22 = arith.cmpi eq, %2, %21 : vector<16x128xi32>
    %23 = arith.extui %22 : vector<16x128xi1> to vector<16x128xi32>
    %24 = arith.sitofp %23 : vector<16x128xi32> to vector<16x128xf32>
    %c0_11 = arith.constant 0 : index
    %c0_12 = arith.constant 0 : index
    %c0_13 = arith.constant 0 : index
    %25 = vector.load %arg2[%c0_11, %c0_12, %c0_13] : memref<3x128x128xf32, #tpu.memory_space<vmem>>, vector<1x128x128xf32>
    %26 = vector.shape_cast %25 : vector<1x128x128xf32> to vector<128x128xf32>
    %cst_14 = arith.constant dense<0.000000e+00> : vector<16x128xf32>
    %27 = tpu.matmul %24, %26, %cst_14 {dimension_numbers = #tpu.dot_dimension_numbers<[1], [0], [0], [1], [0, 0, 1, 1], [], []>, precision = #tpu.contract_precision<fp32>} : vector<16x128xf32>, vector<128x128xf32>, vector<16x128xf32> -> vector<16x128xf32>
    %28 = arith.subf %27, %0 : vector<16x128xf32>
    %29 = arith.mulf %28, %28 : vector<16x128xf32>
    %cst_15 = arith.constant dense<0.000000e+00> : vector<16xf32>
    %30 = vector.multi_reduction <add>, %29, %cst_15 [1] : vector<16x128xf32> to vector<16xf32>
    %31 = vector.shape_cast %30 : vector<16xf32> to vector<16x1xf32>
    %cst_16 = arith.constant dense<0.000000e+00> : vector<1xf32>
    %32 = vector.multi_reduction <add>, %31, %cst_16 [0] : vector<16x1xf32> to vector<1xf32>
    %33 = vector.shape_cast %32 : vector<1xf32> to vector<1x1xf32>
    %34 = arith.addf %1, %27 : vector<16x128xf32>
    %35 = arith.subf %0, %27 : vector<16x128xf32>
    %c1 = arith.constant 1 : index
    %c0_17 = arith.constant 0 : index
    %c0_18 = arith.constant 0 : index
    %36 = vector.load %arg3[%c1, %c0_17, %c0_18] : memref<3x128x128xbf16, #tpu.memory_space<vmem>>, vector<1x128x128xbf16>
    %37 = vector.shape_cast %36 : vector<1x128x128xbf16> to vector<128x128xbf16>
    %c1_19 = arith.constant 1 : index
    %c0_20 = arith.constant 0 : index
    %c0_21 = arith.constant 0 : index
    %38 = vector.load %arg4[%c1_19, %c0_20, %c0_21] : memref<3x1x128xf32, #tpu.memory_space<vmem>>, vector<1x1x128xf32>
    %39 = vector.shape_cast %38 : vector<1x1x128xf32> to vector<1x128xf32>
    %40 = arith.truncf %35 : vector<16x128xf32> to vector<16x128xbf16>
    %cst_22 = arith.constant dense<0.000000e+00> : vector<16x128xf32>
    %41 = tpu.matmul %40, %37, %cst_22 {dimension_numbers = #tpu.dot_dimension_numbers<[1], [1], [0], [0], [0, 0, 1, 0], [], []>} : vector<16x128xbf16>, vector<128x128xbf16>, vector<16x128xf32> -> vector<16x128xf32>
    %cst_23 = arith.constant 2.000000e+00 : f32
    %42 = vector.broadcast %cst_23 : f32 to vector<16x128xf32>
    %43 = arith.mulf %42, %41 : vector<16x128xf32>
    %44 = vector.broadcast %39 : vector<1x128xf32> to vector<16x128xf32>
    %45 = arith.subf %44, %43 : vector<16x128xf32>
    %cst_24 = arith.constant dense<0x7F800000> : vector<16xf32>
    %46 = vector.multi_reduction <minimumf>, %45, %cst_24 [1] : vector<16x128xf32> to vector<16xf32>
    %47 = vector.shape_cast %46 : vector<16xf32> to vector<16x1xf32>
    %48 = vector.broadcast %47 : vector<16x1xf32> to vector<16x128xf32>
    %49 = arith.cmpf ole, %45, %48 : vector<16x128xf32>
    %c128_i32_25 = arith.constant 128 : i32
    %50 = vector.broadcast %c128_i32_25 : i32 to vector<16x128xi32>
    %51 = arith.select %49, %2, %50 : vector<16x128xi1>, vector<16x128xi32>
    %cst_26 = arith.constant dense<2147483647> : vector<16xi32>
    %52 = vector.multi_reduction <minsi>, %51, %cst_26 [1] : vector<16x128xi32> to vector<16xi32>
    %53 = vector.shape_cast %52 : vector<16xi32> to vector<16x1xi32>
    %54 = vector.broadcast %53 : vector<16x1xi32> to vector<16x128xi32>
    %55 = arith.cmpi eq, %2, %54 : vector<16x128xi32>
    %56 = arith.extui %55 : vector<16x128xi1> to vector<16x128xi32>
    %57 = arith.sitofp %56 : vector<16x128xi32> to vector<16x128xf32>
    %c1_27 = arith.constant 1 : index
    %c0_28 = arith.constant 0 : index
    %c0_29 = arith.constant 0 : index
    %58 = vector.load %arg2[%c1_27, %c0_28, %c0_29] : memref<3x128x128xf32, #tpu.memory_space<vmem>>, vector<1x128x128xf32>
    %59 = vector.shape_cast %58 : vector<1x128x128xf32> to vector<128x128xf32>
    %cst_30 = arith.constant dense<0.000000e+00> : vector<16x128xf32>
    %60 = tpu.matmul %57, %59, %cst_30 {dimension_numbers = #tpu.dot_dimension_numbers<[1], [0], [0], [1], [0, 0, 1, 1], [], []>, precision = #tpu.contract_precision<fp32>} : vector<16x128xf32>, vector<128x128xf32>, vector<16x128xf32> -> vector<16x128xf32>
    %61 = arith.subf %60, %35 : vector<16x128xf32>
    %62 = arith.mulf %61, %61 : vector<16x128xf32>
    %cst_31 = arith.constant dense<0.000000e+00> : vector<16xf32>
    %63 = vector.multi_reduction <add>, %62, %cst_31 [1] : vector<16x128xf32> to vector<16xf32>
    %64 = vector.shape_cast %63 : vector<16xf32> to vector<16x1xf32>
    %cst_32 = arith.constant dense<0.000000e+00> : vector<1xf32>
    %65 = vector.multi_reduction <add>, %64, %cst_32 [0] : vector<16x1xf32> to vector<1xf32>
    %66 = vector.shape_cast %65 : vector<1xf32> to vector<1x1xf32>
    %67 = arith.addf %34, %60 : vector<16x128xf32>
    %68 = arith.subf %35, %60 : vector<16x128xf32>
    %c2 = arith.constant 2 : index
    %c0_33 = arith.constant 0 : index
    %c0_34 = arith.constant 0 : index
    %69 = vector.load %arg3[%c2, %c0_33, %c0_34] : memref<3x128x128xbf16, #tpu.memory_space<vmem>>, vector<1x128x128xbf16>
    %70 = vector.shape_cast %69 : vector<1x128x128xbf16> to vector<128x128xbf16>
    %c2_35 = arith.constant 2 : index
    %c0_36 = arith.constant 0 : index
    %c0_37 = arith.constant 0 : index
    %71 = vector.load %arg4[%c2_35, %c0_36, %c0_37] : memref<3x1x128xf32, #tpu.memory_space<vmem>>, vector<1x1x128xf32>
    %72 = vector.shape_cast %71 : vector<1x1x128xf32> to vector<1x128xf32>
    %73 = arith.truncf %68 : vector<16x128xf32> to vector<16x128xbf16>
    %cst_38 = arith.constant dense<0.000000e+00> : vector<16x128xf32>
    %74 = tpu.matmul %73, %70, %cst_38 {dimension_numbers = #tpu.dot_dimension_numbers<[1], [1], [0], [0], [0, 0, 1, 0], [], []>} : vector<16x128xbf16>, vector<128x128xbf16>, vector<16x128xf32> -> vector<16x128xf32>
    %cst_39 = arith.constant 2.000000e+00 : f32
    %75 = vector.broadcast %cst_39 : f32 to vector<16x128xf32>
    %76 = arith.mulf %75, %74 : vector<16x128xf32>
    %77 = vector.broadcast %72 : vector<1x128xf32> to vector<16x128xf32>
    %78 = arith.subf %77, %76 : vector<16x128xf32>
    %cst_40 = arith.constant dense<0x7F800000> : vector<16xf32>
    %79 = vector.multi_reduction <minimumf>, %78, %cst_40 [1] : vector<16x128xf32> to vector<16xf32>
    %80 = vector.shape_cast %79 : vector<16xf32> to vector<16x1xf32>
    %81 = vector.broadcast %80 : vector<16x1xf32> to vector<16x128xf32>
    %82 = arith.cmpf ole, %78, %81 : vector<16x128xf32>
    %c128_i32_41 = arith.constant 128 : i32
    %83 = vector.broadcast %c128_i32_41 : i32 to vector<16x128xi32>
    %84 = arith.select %82, %2, %83 : vector<16x128xi1>, vector<16x128xi32>
    %cst_42 = arith.constant dense<2147483647> : vector<16xi32>
    %85 = vector.multi_reduction <minsi>, %84, %cst_42 [1] : vector<16x128xi32> to vector<16xi32>
    %86 = vector.shape_cast %85 : vector<16xi32> to vector<16x1xi32>
    %87 = vector.broadcast %86 : vector<16x1xi32> to vector<16x128xi32>
    %88 = arith.cmpi eq, %2, %87 : vector<16x128xi32>
    %89 = arith.extui %88 : vector<16x128xi1> to vector<16x128xi32>
    %90 = arith.sitofp %89 : vector<16x128xi32> to vector<16x128xf32>
    %c2_43 = arith.constant 2 : index
    %c0_44 = arith.constant 0 : index
    %c0_45 = arith.constant 0 : index
    %91 = vector.load %arg2[%c2_43, %c0_44, %c0_45] : memref<3x128x128xf32, #tpu.memory_space<vmem>>, vector<1x128x128xf32>
    %92 = vector.shape_cast %91 : vector<1x128x128xf32> to vector<128x128xf32>
    %cst_46 = arith.constant dense<0.000000e+00> : vector<16x128xf32>
    %93 = tpu.matmul %90, %92, %cst_46 {dimension_numbers = #tpu.dot_dimension_numbers<[1], [0], [0], [1], [0, 0, 1, 1], [], []>, precision = #tpu.contract_precision<fp32>} : vector<16x128xf32>, vector<128x128xf32>, vector<16x128xf32> -> vector<16x128xf32>
    %94 = arith.subf %93, %68 : vector<16x128xf32>
    %95 = arith.mulf %94, %94 : vector<16x128xf32>
    %cst_47 = arith.constant dense<0.000000e+00> : vector<16xf32>
    %96 = vector.multi_reduction <add>, %95, %cst_47 [1] : vector<16x128xf32> to vector<16xf32>
    %97 = vector.shape_cast %96 : vector<16xf32> to vector<16x1xf32>
    %cst_48 = arith.constant dense<0.000000e+00> : vector<1xf32>
    %98 = vector.multi_reduction <add>, %97, %cst_48 [0] : vector<16x1xf32> to vector<1xf32>
    %99 = vector.shape_cast %98 : vector<1xf32> to vector<1x1xf32>
    %100 = arith.addf %67, %93 : vector<16x128xf32>
    %101 = tpu.concatenate %20, %53, %86 in 1 : vector<16x1xi32>, vector<16x1xi32>, vector<16x1xi32> -> vector<16x3xi32>
    %c0_49 = arith.constant 0 : index
    %c0_50 = arith.constant 0 : index
    %102 = vector.load %arg6[%c0_49, %c0_50] : memref<16x3xi32, #tpu.memory_space<vmem>>, vector<16x3xi32>
    tpu.vector_store %arg6[%c0_49, %c0_50], %101 {strides = array<i32>} : memref<16x3xi32, #tpu.memory_space<vmem>>, vector<16x3xi32>,
    %c0_51 = arith.constant 0 : index
    %c0_52 = arith.constant 0 : index
    %103 = vector.load %arg5[%c0_51, %c0_52] : memref<16x128xf32, #tpu.memory_space<vmem>>, vector<16x128xf32>
    tpu.vector_store %arg5[%c0_51, %c0_52], %100 {strides = array<i32>} : memref<16x128xf32, #tpu.memory_space<vmem>>, vector<16x128xf32>,
    %104 = tpu.concatenate %33, %66, %99 in 1 : vector<1x1xf32>, vector<1x1xf32>, vector<1x1xf32> -> vector<1x3xf32>
    %105 = vector.shape_cast %104 : vector<1x3xf32> to vector<1x1x3xf32>
    %c0_53 = arith.constant 0 : index
    %c0_54 = arith.constant 0 : index
    %c0_55 = arith.constant 0 : index
    %106 = vector.load %arg7[%c0_53, %c0_54, %c0_55] : memref<1x1x3xf32, #tpu.memory_space<vmem>>, vector<1x1x3xf32>
    tpu.vector_store %arg7[%c0_53, %c0_54, %c0_55], %105 {strides = array<i32>} : memref<1x1x3xf32, #tpu.memory_space<vmem>>, vector<1x1x3xf32>,
    return
  }
  func.func @transform_0(%arg0: i32) -> (i32, i32) {
    %c0_i32 = arith.constant 0 : i32
    %c0_i32_0 = arith.constant 0 : i32
    return %arg0, %c0_i32 : i32, i32
  }
  func.func @transform_1(%arg0: i32) -> (i32, i32, i32) {
    %c0_i32 = arith.constant 0 : i32
    %c0_i32_0 = arith.constant 0 : i32
    %c0_i32_1 = arith.constant 0 : i32
    %c0_i32_2 = arith.constant 0 : i32
    return %c0_i32, %c0_i32_0, %c0_i32_1 : i32, i32, i32
  }
  func.func @transform_2(%arg0: i32) -> (i32, i32, i32) {
    %c0_i32 = arith.constant 0 : i32
    %c0_i32_0 = arith.constant 0 : i32
    %c0_i32_1 = arith.constant 0 : i32
    %c0_i32_2 = arith.constant 0 : i32
    return %c0_i32, %c0_i32_0, %c0_i32_1 : i32, i32, i32
  }
  func.func @transform_3(%arg0: i32) -> (i32, i32, i32) {
    %c0_i32 = arith.constant 0 : i32
    %c0_i32_0 = arith.constant 0 : i32
    %c0_i32_1 = arith.constant 0 : i32
    %c0_i32_2 = arith.constant 0 : i32
    return %c0_i32, %c0_i32_0, %c0_i32_1 : i32, i32, i32
  }
  func.func @transform_4(%arg0: i32) -> (i32, i32) {
    %c0_i32 = arith.constant 0 : i32
    %c0_i32_0 = arith.constant 0 : i32
    return %arg0, %c0_i32 : i32, i32
  }
  func.func @transform_5(%arg0: i32) -> (i32, i32) {
    %c0_i32 = arith.constant 0 : i32
    %c0_i32_0 = arith.constant 0 : i32
    return %arg0, %c0_i32 : i32, i32
  }
  func.func @transform_6(%arg0: i32) -> (i32, i32, i32) {
    %c0_i32 = arith.constant 0 : i32
    %c0_i32_0 = arith.constant 0 : i32
    %c0_i32_1 = arith.constant 0 : i32
    return %arg0, %c0_i32, %c0_i32_0 : i32, i32, i32
  }
}

</mosaic_0001>

<bundles_post_ra>
// kernel: tpu_custom_call.1
= control target key start
LH: loop header
LB: loop body
LE: loop exit
PB: predicated region body
PF: predicated region fallthrough
CT: control target
= control target key end

     0   :  { %12 = vsyncpa [#allocation3], 0  ;;  %s5973_s0 = inlined_call_operand.hbm [shape: f32[16,128], index: 0, kind: input, shape index: {}]   ;;  %s5974_s1 = inlined_call_operand.hbm [shape: f32[3,128,128], index: 1, kind: input, shape index: {}]   ;;  %s5975_s2 = inlined_call_operand.hbm [shape: bf16[3,128,128], index: 2, kind: input, shape index: {}]   ;;  %s5976_s3 = inlined_call_operand.vmem [shape: f32[3,1,128], index: 3, kind: input, shape index: {}]   ;;  %s5977_s4 = inlined_call_operand.hbm [shape: f32[16,128], index: 4, kind: output, shape index: {0}]   ;;  %s5978_s5 = inlined_call_operand.vmem [shape: s32[16,3], index: 5, kind: output, shape index: {1}]   ;;  %s5979_s6 = inlined_call_operand.hbm [shape: f32[1,1,3], index: 6, kind: output, shape index: {2}]  }
   0x1   :  { %13 = vsyncpa [#allocation6], 0 }
   0x2   :  { %14 = vsyncpa [#allocation4], 0 }
   0x3   :  { %15 = vsyncpa [#allocation10], 0  ;;  %s4613_s21 = smov [#allocation5]   ;;  %s4614_s23 = smov [#allocation2]  }
   0x4   :  { %s33_s22 = sshll.u32 %s4613_s21, 4  ;;  %s21_s24 = sshll.u32 %s4614_s23, 4  ;;  %s34_s22 = int_to_ptr.vmem [resolvable:$true] %s33_s22  ;;  %s4660_s24 = int_to_ptr.vmem [resolvable:$true] %s21_s24 }
   0x5   :  { %s4495_s27 = scalar_lea.hbm %s5974_s1, 6144 }
   0x6   :  { %p4496_p0 = scmp.ne.s32.totalorder %s5974_s1, %s4495_s27  ;;  %p4499_p1 = scmp.lt.u32.totalorder %s4495_s27, %s5974_s1 }
   0x8   :  { %p4501_p2 = pnand %p4499_p1, %p4496_p0 }
   0xa   :  { %4504 = shalt.err (!%p4501_p2)
}
   0xb   :  { %s4505_s8 = scalar_lea.vmem %s34_s22, 6144  ;;  %p4510_p4 = scmp.lt.s32.totalorder %s34_s22, %s34_s22 }
   0xc   :  { %p4506_p3 = scmp.ne.s32.totalorder %s34_s22, %s4505_s8  ;;  %p4511_p5 = scmp.lt.s32.totalorder %s4505_s8, %s4505_s8 }
   0xe   :  { %p4512_p6 = por %p4511_p5, %p4510_p4 }
  0x10   :  { %p4513_p7 = pnand %p4512_p6, %p4506_p3 }
  0x12   :  { %4516 = shalt.err (!%p4513_p7)
}
  0x13   :  { %s4615_s9 = smov 128   ;;  %s4616_s10 = smov 8  }
  0x14   :  { %39 = dma.hbm_to_vmem [thread:$0]  %s5974_s1, 6144, %s34_s22, [#allocation6], %s4615_s9, %s4615_s9, %s4616_s10  }
  0x15   :  { %s4517_s15 = scalar_lea.hbm %s5973_s0, 256 }
  0x16   :  { %p4518_p8 = scmp.ne.s32.totalorder %s5973_s0, %s4517_s15  ;;  %p4521_p9 = scmp.lt.u32.totalorder %s4517_s15, %s5973_s0 }
  0x18   :  { %p4523_p10 = pnand %p4521_p9, %p4518_p8 }
  0x1a   :  { %4526 = shalt.err (!%p4523_p10)
}
  0x1b   :  { %s4527_s20 = scalar_lea.vmem %s4660_s24, 256  ;;  %p4532_p12 = scmp.lt.s32.totalorder %s4660_s24, %s4660_s24 }
  0x1c   :  { %p4528_p11 = scmp.ne.s32.totalorder %s4660_s24, %s4527_s20  ;;  %p4533_p13 = scmp.lt.s32.totalorder %s4527_s20, %s4527_s20 }
  0x1e   :  { %p4534_p0 = por %p4533_p13, %p4532_p12 }
  0x20   :  { %p4535_p1 = pnand %p4534_p0, %p4528_p11 }
  0x22   :  { %4538 = shalt.err (!%p4535_p1)
}
  0x23   :  { %27 = dma.hbm_to_vmem [thread:$0]  %s5973_s0, 256, %s4660_s24, [#allocation3], %s4615_s9, %s4615_s9, %s4616_s10  }
  0x24   :  { %s4617_s22 = smov [#allocation7]   ;;  %s4539_s27 = scalar_lea.hbm %s5975_s2, 3072 }
  0x25   :  { %s45_s23 = sshll.u32 %s4617_s22, 4  ;;  %p4540_p2 = scmp.ne.s32.totalorder %s5975_s2, %s4539_s27  ;;  %s46_s23 = int_to_ptr.vmem [resolvable:$true] %s45_s23 }
  0x26   :  { %p4543_p3 = scmp.lt.u32.totalorder %s4539_s27, %s5975_s2 }
  0x28   :  { %p4545_p4 = pnand %p4543_p3, %p4540_p2 }
  0x2a   :  { %4548 = shalt.err (!%p4545_p4)
}
  0x2b   :  { %s4549_s8 = scalar_lea.vmem %s46_s23, 3072  ;;  %p4554_p6 = scmp.lt.s32.totalorder %s46_s23, %s46_s23 }
  0x2c   :  { %p4550_p5 = scmp.ne.s32.totalorder %s46_s23, %s4549_s8  ;;  %p4555_p7 = scmp.lt.s32.totalorder %s4549_s8, %s4549_s8 }
  0x2e   :  { %p4556_p8 = por %p4555_p7, %p4554_p6 }
  0x30   :  { %p4557_p9 = pnand %p4556_p8, %p4550_p5 }
  0x32   :  { %4560 = shalt.err (!%p4557_p9)
}
  0x33   :  { %s4618_s0 = smov 64   ;;  %s4619_s24 = smov 4  }
  0x34   :  { %51 = dma.hbm_to_vmem [thread:$0]  %s5975_s2, 3072, %s46_s23, [#allocation6], %s4618_s0, %s4618_s0, %s4619_s24  }
  0x35   :  { %4605 = dma.done.wait [#allocation3], 256  }
  0x36   :  { %4606 = vsyncadd [#allocation3], 4294967040 }
  0x37   :  { %4607 = dma.done.wait [#allocation6], 9216  }
  0x38   :  { %4608 = vsyncadd [#allocation6], 4294958080  ;;  %v5993_v0 = vmov 0.0   ;;  %vm4621_vm0 = vmmov 0   ;;  %v4469_v1 = vld [vmem:[#allocation7] sm:$0xff]   ;;  %v4470_v2 = vld [vmem:[#allocation7 + $0x8] sm:$0xff]   ;;  %v66_v21 = vlaneseq }
  0x39   :  { %3161 = vmatprep.subr.bf16.mxu0 %v5993_v0  ;;  %3177 = vmatprep.mubr.msk.bf16.mxu0 %vm4621_vm0, %v5993_v0  ;;  %v4471_v3 = vld [vmem:[#allocation7 + $0x10] sm:$0xff]   ;;  %v4472_v4 = vld [vmem:[#allocation7 + $0x18] sm:$0xff]   ;;  %v4473_v5 = vld [vmem:[#allocation7 + $0x20] sm:$0xff]  }
  0x3a   :  { %3162 = vmatpush3.bf16.xpose.msra.mxu0 %v4469_v1  ;;  %v4474_v6 = vld [vmem:[#allocation7 + $0x28] sm:$0xff]   ;;  %v4475_v7 = vld [vmem:[#allocation7 + $0x30] sm:$0xff]   ;;  %v4476_v8 = vld [vmem:[#allocation7 + $0x38] sm:$0xff]   ;;  %v4731_v22 = vand.u32 127, %v66_v21 }
  0x3b   :  { %3163 = vmatprep.subr.bf16.mxu0 %v5993_v0  ;;  %v4719_v9 = vld [vmem:[#allocation2] sm:$0xff]  ;;  %v4721_v10 = vld [vmem:[#allocation2 + $0x8] sm:$0xff]  ;;  %v227_v31 = vld [vmem:[#allocation5] sm:$0xff] }
  0x3c   :  { %v85_v11 = vpack.c.bf16 %v4721_v10, %v4719_v9  ;;  %v2765_v13 = vld [vmem:[%s5976_s3] ss:$0 sm:$0xff]  ;;  %v228_v32 = vld [vmem:[#allocation5 + $0x8] sm:$0xff]  ;;  %v244_v34 = vand.u32 4294901760, %v227_v31  ;;  %v4737_v36 = vld [vmem:[#allocation5 + $0x18] sm:$0xff] }
  0x3d   :  { %v4735_v33 = vld [vmem:[#allocation5 + $0x10] sm:$0xff]  ;;  %v247_v35 = vand.u32 4294901760, %v228_v32  ;;  %v4740_v38 = vld [vmem:[#allocation5 + $0x20] sm:$0xff]  ;;  %v4742_v39 = vld [vmem:[#allocation5 + $0x28] sm:$0xff]  ;;  %v253_v40 = vand.u32 4294901760, %v4737_v36 }
  0x3e   :  { %v250_v37 = vand.u32 4294901760, %v4735_v33  ;;  %v256_v42 = vand.u32 4294901760, %v4740_v38  ;;  %v259_v43 = vand.u32 4294901760, %v4742_v39  ;;  %v4755_v45 = vld [vmem:[#allocation5 + $0x30] sm:$0xff]  ;;  %v4757_v46 = vld [vmem:[#allocation5 + $0x38] sm:$0xff]  ;;  %v235_v59 = vld [vmem:[#allocation5 + $0x40] sm:$0xff] }
  0x3f   :  { %v4745_v41 = vpack.c.bf16 %v247_v35, %v244_v34  ;;  %v262_v48 = vand.u32 4294901760, %v4755_v45  ;;  %v265_v49 = vand.u32 4294901760, %v4757_v46  ;;  %v236_v60 = vld [vmem:[#allocation5 + $0x48] sm:$0xff]  ;;  %v268_v61 = vand.u32 4294901760, %v235_v59  ;;  %v237_v1 = vld [vmem:[#allocation5 + $0x50] sm:$0xff] }
  0x40   :  { %v4753_v44 = vpack.c.bf16 %v253_v40, %v250_v37  ;;  %v4766_v47 = vpack.c.bf16 %v259_v43, %v256_v42  ;;  %v271_v62 = vand.u32 4294901760, %v236_v60 }
  0x41   :  { %3852 = vmatprep.subr.bf16.mxu1 %v4745_v41  ;;  %v4776_v50 = vpack.c.bf16 %v265_v49, %v262_v48 }
  0x42   :  { %3164 = vmatpush3.bf16.xpose.msra.mxu0 %v4470_v2  ;;  %3854 = vmatpush3.bf16.msra.mxu1 %v4745_v41  ;;  %v4787_v63 = vpack.c.bf16 %v271_v62, %v268_v61  ;;  %v238_v2 = vld [vmem:[#allocation5 + $0x58] sm:$0xff] }
  0x43   :  { %3165 = vmatprep.subr.bf16.mxu0 %v5993_v0  ;;  %3856 = vmatprep.subr.bf16.mxu1 %v4753_v44 }
  0x46   :  { %3858 = vmatpush3.bf16.msra.mxu1 %v4753_v44 }
  0x47   :  { %3860 = vmatprep.subr.bf16.mxu1 %v4766_v47 }
  0x4a   :  { %3166 = vmatpush3.bf16.xpose.msra.mxu0 %v4471_v3  ;;  %3862 = vmatpush3.bf16.msra.mxu1 %v4766_v47  ;;  %v274_v3 = vand.u32 4294901760, %v237_v1 }
  0x4b   :  { %3167 = vmatprep.subr.bf16.mxu0 %v5993_v0  ;;  %3864 = vmatprep.subr.bf16.mxu1 %v4776_v50 }
  0x4e   :  { %3866 = vmatpush3.bf16.msra.mxu1 %v4776_v50 }
  0x4f   :  { %3868 = vmatprep.subr.bf16.mxu1 %v4787_v63 }
  0x52   :  { %3168 = vmatpush3.bf16.xpose.msra.mxu0 %v4472_v4  ;;  %v277_v4 = vand.u32 4294901760, %v238_v2  ;;  %3870 = vmatpush3.bf16.msra.mxu1 %v4787_v63 }
  0x53   :  { %3169 = vmatprep.subr.bf16.mxu0 %v5993_v0 }
  0x5a   :  { %3170 = vmatpush3.bf16.xpose.msra.mxu0 %v4473_v5  ;;  %v4791_v5 = vpack.c.bf16 %v277_v4, %v274_v3 }
  0x5b   :  { %3171 = vmatprep.subr.bf16.mxu0 %v5993_v0 }
  0x5c   :  { %3872 = vmatprep.subr.bf16.mxu1 %v4791_v5 }
  0x5d   :  { %3874 = vmatpush3.bf16.msra.mxu1 %v4791_v5 }
  0x62   :  { %3172 = vmatpush3.bf16.xpose.msra.mxu0 %v4474_v6  ;;  %v239_v6 = vld [vmem:[#allocation5 + $0x60] sm:$0xff] }
  0x63   :  { %3173 = vmatprep.subr.bf16.mxu0 %v5993_v0 }
  0x6a   :  { %3174 = vmatpush3.bf16.xpose.msra.mxu0 %v4475_v7  ;;  %v240_v7 = vld [vmem:[#allocation5 + $0x68] sm:$0xff] }
  0x6b   :  { %3175 = vmatprep.subr.bf16.mxu0 %v5993_v0 }
  0x72   :  { %3176 = vmatpush3.bf16.xpose.msra.mxu0 %v4476_v8  ;;  %v280_v8 = vand.u32 4294901760, %v239_v6 }
  0x73   :  { %3391 = vmatprep.subr.bf16.mxu0 %v5993_v0 }
  0x79   :  { %3178 = vmatmul.mubr.bf16.vlgmr.msra.gmra.mrb[0].mxu0 %v85_v11  ;;  %v283_v11 = vand.u32 4294901760, %v240_v7 }
  0x7a   :  { %3407 = vmatprep.mubr.msk.bf16.mxu0 %vm4621_vm0, %v5993_v0 }
 0x14c   :  { %v168_v12 = vpop.f32.mrb[0].mxu0 }
 0x14d   :  { %v175_v14 = vmul.f32 2.0, %v168_v12  ;;  %v3179_v15 = vpop.f32.mrb[1].mxu0  ;;  %v4795_v12 = vpack.c.bf16 %v283_v11, %v280_v8 }
 0x14e   :  { %v171_v16 = vpop.f32.mrb[2].mxu0  ;;  %v241_v15 = vld [vmem:[#allocation5 + $0x70] sm:$0xff] }
 0x14f   :  { %v176_v17 = vmul.f32 2.0, %v171_v16  ;;  %v3180_v18 = vpop.f32.mrb[3].mxu0  ;;  %v183_v19 = vsub.f32 %v2765_v13, %v175_v14  ;;  %v4799_v14 = vsub.f32 %v228_v32, %v247_v35  ;;  %v242_v16 = vld [vmem:[#allocation5 + $0x78] sm:$0xff]  ;;  %3876 = vmatprep.subr.bf16.mxu1 %v4795_v12  ;;  %v4830_v35 = vsub.f32 %v237_v1, %v274_v3 }
 0x150   :  { %v289_v18 = vand.u32 4294901760, %v242_v16  ;;  %3878 = vmatpush3.bf16.msra.mxu1 %v4795_v12 }
 0x151   :  { %185 = vmin.xlane.f32.xlu0 %v183_v19  ;;  %v184_v20 = vsub.f32 %v2765_v13, %v176_v17  ;;  %v4797_v13 = vsub.f32 %v227_v31, %v244_v34  ;;  %v286_v17 = vand.u32 4294901760, %v241_v15 }
 0x153   :  { %v4805_v21 = vpack.c.bf16 %v289_v18, %v286_v17 }
 0x155   :  { %187 = vmin.xlane.f32.xlu0 %v184_v20  ;;  %3880 = vmatprep.subr.bf16.mxu1 %v4805_v21 }
 0x156   :  { %3882 = vmatpush3.bf16.msra.mxu1 %v4805_v21 }
 0x1de   :  { %v186_v23 = vpop.xlane.xlu0 %185 }
 0x1df   :  { %vm189_vm1 = vcmp.le.f32.partialorder %v183_v19, %v186_v23  ;;  %v347_v19 = vand.u32 4294901760, %v4797_v13 }
 0x1e0   :  { %v191_v24 = vsel %vm189_vm1, %v4731_v22, 128  ;;  %vm2706_vm1 = vcmask 7168  }
 0x1e1   :  { %v194_v25 = vshra.s32 %v191_v24, 16  ;;  %v193_v51 = vand.u32 65535, %v191_v24  ;;  %v348_v23 = vsub.f32 %v4797_v13, %v347_v19 }
 0x1e2   :  { %v188_v26 = vpop.xlane.xlu0 %187 }
 0x1e3   :  { %vm190_vm2 = vcmp.le.f32.partialorder %v184_v20, %v188_v26  ;;  %v196_v27 = vcvt.s32.f32 %v194_v25  ;;  %v195_v54 = vcvt.s32.f32 %v193_v51  ;;  %v354_v20 = vand.u32 4294901760, %v4799_v14 }
 0x1e4   :  { %v192_v28 = vsel %vm190_vm2, %v4731_v22, 128  ;;  %v349_v25 = vand.u32 4294901760, %v348_v23  ;;  %v4832_v51 = vsub.f32 %v238_v2, %v277_v4  ;;  %vm2709_vm2 = vcmask 15360  }
 0x1e5   :  { %197 = vmin.xlane.f32.xlu1 %v196_v27  ;;  %v208_v29 = vshra.s32 %v192_v28, 16  ;;  %v207_v52 = vand.u32 65535, %v192_v28  ;;  %v355_v24 = vsub.f32 %v4799_v14, %v354_v20  ;;  %v4818_v28 = vsub.f32 %v235_v59, %v268_v61 }
 0x1e6   :  { %v4844_v61 = vsub.f32 %v239_v6, %v280_v8 }
 0x1e7   :  { %v210_v30 = vcvt.s32.f32 %v208_v29  ;;  %v209_v57 = vcvt.s32.f32 %v207_v52  ;;  %v356_v26 = vand.u32 4294901760, %v355_v24  ;;  %v4820_v29 = vsub.f32 %v236_v60, %v271_v62 }
 0x1e8   :  { %v4846_v62 = vsub.f32 %v240_v7, %v283_v11  ;;  %v5983_v3 = vand.u32 4294901760, %v4844_v61 }
 0x1e9   :  { %211 = vmin.xlane.f32.xlu1 %v210_v30  ;;  %v5986_v31 = vand.u32 4294901760, %v4820_v29 }
 0x1ea   :  { %v5982_v4 = vand.u32 4294901760, %v4846_v62  ;;  %v432_v24 = vsub.f32 %v4844_v61, %v5983_v3 }
 0x1eb   :  { %v411_v34 = vsub.f32 %v4820_v29, %v5986_v31 }
 0x1ec   :  { %v439_v6 = vsub.f32 %v4846_v62, %v5982_v4  ;;  %v433_v7 = vand.u32 4294901760, %v432_v24 }
 0x272   :  { %v4781_v53 = vpop.xlane.xlu1 %197 }
 0x273   :  { %vm199_vm3 = vcmp.eq.f32.partialorder %v196_v27, %v4781_v53  ;;  %v4815_v27 = vpack.c.bf16 %v356_v26, %v349_v25  ;;  %v4855_v25 = vsub.f32 %v241_v15, %v286_v17  ;;  %v4857_v26 = vsub.f32 %v242_v16, %v289_v18 }
 0x274   :  { %v200_v55 = vsel %vm199_vm3, %v195_v54, inf  ;;  %v412_v54 = vand.u32 4294901760, %v411_v34  ;;  %v204_v24 = vcvt.f32.s32 %v4781_v53  ;;  %vm2712_vm3 = vcmask 23552  }
 0x275   :  { %201 = vmin.xlane.f32.xlu0 %v200_v55  ;;  %3884 = vmatprep.subr.bf16.mxu1 %v4815_v27  ;;  %v5985_v55 = vand.u32 4294901760, %v4830_v35  ;;  %v5981_v8 = vand.u32 4294901760, %v4855_v25  ;;  %v5980_v11 = vand.u32 4294901760, %v4857_v26 }
 0x276   :  { %v4784_v56 = vpop.xlane.xlu1 %211 }
 0x277   :  { %vm213_vm4 = vcmp.eq.f32.partialorder %v210_v30, %v4784_v56  ;;  %v5987_v30 = vand.u32 4294901760, %v4818_v28  ;;  %v418_v59 = vsub.f32 %v4830_v35, %v5985_v55  ;;  %v446_v34 = vsub.f32 %v4855_v25, %v5981_v8 }
 0x278   :  { %v214_v58 = vsel %vm213_vm4, %v209_v57, inf  ;;  %v5984_v57 = vand.u32 4294901760, %v4832_v51  ;;  %v453_v15 = vsub.f32 %v4857_v26, %v5980_v11 }
 0x279   :  { %215 = vmin.xlane.f32.xlu1 %v214_v58  ;;  %v404_v32 = vsub.f32 %v4818_v28, %v5987_v30  ;;  %v419_v1 = vand.u32 4294901760, %v418_v59  ;;  %v447_v17 = vand.u32 4294901760, %v446_v34  ;;  %v4880_v59 = vpack.c.bf16 %v4820_v29, %v4818_v28 }
 0x27a   :  { %v425_v60 = vsub.f32 %v4832_v51, %v5984_v57  ;;  %v454_v18 = vand.u32 4294901760, %v453_v15  ;;  %v205_v34 = vshll.u32 %v204_v24, 16  ;;  %v218_v15 = vcvt.f32.s32 %v4784_v56 }
 0x27b   :  { %v405_v52 = vand.u32 4294901760, %v404_v32  ;;  %v440_v32 = vand.u32 4294901760, %v439_v6 }
 0x27c   :  { %v426_v2 = vand.u32 4294901760, %v425_v60  ;;  %v4884_v60 = vpack.c.bf16 %v4832_v51, %v4830_v35 }
 0x27d   :  { %v4836_v58 = vpack.c.bf16 %v412_v54, %v405_v52  ;;  %v4870_v16 = vpack.c.bf16 %v440_v32, %v433_v7  ;;  %v4872_v52 = vpack.c.bf16 %v454_v18, %v447_v17  ;;  %v4876_v54 = vpack.c.bf16 %v4799_v14, %v4797_v13 }
 0x27e   :  { %v4850_v23 = vpack.c.bf16 %v426_v2, %v419_v1  ;;  %v4888_v1 = vpack.c.bf16 %v4846_v62, %v4844_v61  ;;  %v4892_v2 = vpack.c.bf16 %v4857_v26, %v4855_v25  ;;  %v4898_v7 = vsub.f32 %v4735_v33, %v250_v37 }
 0x27f   :  { %v4903_v32 = vsub.f32 %v4737_v36, %v253_v40  ;;  %v4913_v33 = vsub.f32 %v4740_v38, %v256_v42  ;;  %v4918_v36 = vsub.f32 %v4742_v39, %v259_v43  ;;  %v219_v37 = vshll.u32 %v218_v15, 16 }
 0x280   :  { %v361_v53 = vand.u32 4294901760, %v4898_v7  ;;  %v4949_v15 = vsub.f32 %v4757_v46, %v265_v49 }
 0x281   :  { %v368_v8 = vand.u32 4294901760, %v4903_v32  ;;  %v375_v42 = vand.u32 4294901760, %v4913_v33  ;;  %v382_v43 = vand.u32 4294901760, %v4918_v36 }
 0x282   :  { %v362_v38 = vsub.f32 %v4898_v7, %v361_v53  ;;  %v396_v3 = vand.u32 4294901760, %v4949_v15 }
 0x283   :  { %v369_v39 = vsub.f32 %v4903_v32, %v368_v8  ;;  %v383_v46 = vsub.f32 %v4918_v36, %v382_v43  ;;  %v3987_v13 = vpack.c.bf16 %v382_v43, %v375_v42 }
 0x285   :  { %v370_v4 = vand.u32 4294901760, %v369_v39  ;;  %v384_v31 = vand.u32 4294901760, %v383_v46 }
 0x302   :  { %v202_v6 = vpop.xlane.xlu0 %201 }
 0x303   :  { %v203_v17 = vcvt.f32.s32 %v202_v6 }
 0x305   :  { %v4906_v18 = vadd.s32 %v205_v34, %v203_v17  ;;  %v4944_v34 = vsub.f32 %v4755_v45, %v262_v48  ;;  %v376_v45 = vsub.f32 %v4913_v33, %v375_v42 }
 0x306   :  { %v216_v11 = vpop.xlane.xlu1 %215 }
 0x307   :  { %vm221_vm5 = vcmp.eq.s32.totalorder %v4731_v22, %v4906_v18  ;;  %v217_v40 = vcvt.f32.s32 %v216_v11  ;;  %v377_v57 = vand.u32 4294901760, %v376_v45 }
 0x308   :  { %v2766_v56 = vsel %vm221_vm5, 1.0, %v5993_v0 }
 0x309   :  { %v4926_v24 = vadd.s32 %v219_v37, %v217_v40  ;;  %v4928_v6 = vsub.f32 %v2766_v56, %v2766_v56  ;;  %v363_v56 = vand.u32 4294901760, %v362_v38 }
 0x30b   :  { %vm222_vm6 = vcmp.eq.s32.totalorder %v4731_v22, %v4926_v24  ;;  %v326_v11 = vand.u32 4294901760, %v4928_v6  ;;  %v3887_v39 = vpack.c.bf16 %v370_v4, %v363_v56  ;;  %v3891_v4 = vpack.c.bf16 %v384_v31, %v377_v57  ;;  %v4478_v57 = vld [vmem:[#allocation7 + $0x48] sm:$0xff]  }
 0x30c   :  { %v2767_v17 = vsel %vm222_vm6, 1.0, %v5993_v0  ;;  %v3923_v31 = vpack.c.bf16 %v4918_v36, %v4913_v33 }
 0x30d   :  { %v4955_v37 = vsub.f32 %v2767_v17, %v2767_v17  ;;  %v327_v40 = vsub.f32 %v4928_v6, %v326_v11  ;;  %v389_v17 = vand.u32 4294901760, %v4944_v34 }
 0x30f   :  { %v328_v48 = vand.u32 4294901760, %v327_v40  ;;  %v336_v49 = vand.u32 4294901760, %v4955_v37  ;;  %v390_v30 = vsub.f32 %v4944_v34, %v389_v17  ;;  %v397_v40 = vsub.f32 %v4949_v15, %v396_v3 }
 0x310   :  { %v3991_v14 = vpack.c.bf16 %v396_v3, %v389_v17  ;;  %v6015_v3 = vand.u32 4294901760, %v4846_v62  ;;  %v5123_v17 = vld [vmem:[#allocation5 + $0x90] sm:$0xff] }
 0x311   :  { %3213 = vmatprep.mubr.f32.mxu1 %v328_v48  ;;  %v337_v38 = vsub.f32 %v4955_v37, %v336_v49  ;;  %v4622_v48 = vmov 1.0   ;;  %v391_v56 = vand.u32 4294901760, %v390_v30  ;;  %v398_v45 = vand.u32 4294901760, %v397_v40  ;;  %v4477_v30 = vld [vmem:[#allocation7 + $0x40] sm:$0xff]   ;;  %v5125_v40 = vld [vmem:[#allocation5 + $0x98] sm:$0xff] }
 0x312   :  { %3392 = vmatpush3.bf16.xpose.msra.mxu0 %v4477_v30 }
 0x313   :  { %v338_v55 = vand.u32 4294901760, %v337_v38  ;;  %v3895_v46 = vpack.c.bf16 %v398_v45, %v391_v56  ;;  %3393 = vmatprep.subr.bf16.mxu0 %v5993_v0  ;;  %v5128_v56 = vld [vmem:[#allocation5 + $0xa0] sm:$0xff]  ;;  %v5130_v45 = vld [vmem:[#allocation5 + $0xa8] sm:$0xff] }
 0x314   :  { %v1137_v30 = vand.u32 4294901760, %v5128_v56 }
 0x315   :  { %3214 = vmatmul.mubr.f32.vlgmr.msra.gmra.mrb[0].mxu1 %v338_v55  ;;  %v3927_v55 = vpack.c.bf16 %v4949_v15, %v4944_v34 }
 0x316   :  { %3886 = vmatpush3.bf16.msra.mxu1 %v4815_v27  ;;  %3248 = vmatprep.mubr.msk.f32.mxu1 %vm221_vm5, %v4622_v48  ;;  %v3919_v27 = vpack.c.bf16 %v4903_v32, %v4898_v7  ;;  %v6013_v7 = vand.u32 4294901760, %v4832_v51 }
 0x317   :  { %3888 = vmatprep.subr.bf16.mxu1 %v3887_v39 }
 0x31a   :  { %3890 = vmatpush3.bf16.msra.mxu1 %v3887_v39  ;;  %3394 = vmatpush3.bf16.xpose.msra.mxu0 %v4478_v57  ;;  %v5143_v57 = vld [vmem:[#allocation5 + $0xb0] sm:$0xff] }
 0x31b   :  { %3892 = vmatprep.subr.bf16.mxu1 %v3891_v4  ;;  %3395 = vmatprep.subr.bf16.mxu0 %v5993_v0 }
 0x31e   :  { %3894 = vmatpush3.bf16.msra.mxu1 %v3891_v4  ;;  %v1131_v4 = vand.u32 4294901760, %v5123_v17 }
 0x31f   :  { %3896 = vmatprep.subr.bf16.mxu1 %v3895_v46 }
 0x322   :  { %3898 = vmatpush3.bf16.msra.mxu1 %v3895_v46  ;;  %v1134_v46 = vand.u32 4294901760, %v5125_v40 }
 0x323   :  { %3900 = vmatprep.subr.bf16.mxu1 %v4836_v58 }
 0x326   :  { %3902 = vmatpush3.bf16.msra.mxu1 %v4836_v58  ;;  %v4479_v58 = vld [vmem:[#allocation7 + $0x50] sm:$0xff]  }
 0x327   :  { %3904 = vmatprep.subr.bf16.mxu1 %v4850_v23  ;;  %3396 = vmatpush3.bf16.xpose.msra.mxu0 %v4479_v58  ;;  %v5145_v58 = vld [vmem:[#allocation5 + $0xb8] sm:$0xff] }
 0x328   :  { %3397 = vmatprep.subr.bf16.mxu0 %v5993_v0 }
 0x32a   :  { %3906 = vmatpush3.bf16.msra.mxu1 %v4850_v23  ;;  %v4480_v23 = vld [vmem:[#allocation7 + $0x58] sm:$0xff]  }
 0x32b   :  { %3908 = vmatprep.subr.bf16.mxu1 %v4870_v16 }
 0x32e   :  { %3910 = vmatpush3.bf16.msra.mxu1 %v4870_v16  ;;  %v4481_v16 = vld [vmem:[#allocation7 + $0x60] sm:$0xff]  }
 0x32f   :  { %3912 = vmatprep.subr.bf16.mxu1 %v4872_v52  ;;  %3398 = vmatpush3.bf16.xpose.msra.mxu0 %v4480_v23 }
 0x330   :  { %3399 = vmatprep.subr.bf16.mxu0 %v5993_v0 }
 0x332   :  { %3914 = vmatpush3.bf16.msra.mxu1 %v4872_v52  ;;  %v4482_v52 = vld [vmem:[#allocation7 + $0x68] sm:$0xff]  }
 0x333   :  { %3916 = vmatprep.subr.bf16.mxu1 %v4876_v54 }
 0x335   :  { %3249 = vmatmul.mubr.msk.f32.vlgmr.msra.gmra.mrb[0].mxu1 %vm222_vm6, %v4622_v48 }
 0x336   :  { %3918 = vmatpush3.bf16.msra.mxu1 %v4876_v54  ;;  %3283 = vmatprep.mubr.f32.mxu1 %v4928_v6  ;;  %v4483_v54 = vld [vmem:[#allocation7 + $0x70] sm:$0xff]  }
 0x337   :  { %3920 = vmatprep.subr.bf16.mxu1 %v3919_v27  ;;  %3400 = vmatpush3.bf16.xpose.msra.mxu0 %v4481_v16  ;;  %v1143_v16 = vand.u32 4294901760, %v5143_v57 }
 0x338   :  { %3401 = vmatprep.subr.bf16.mxu0 %v5993_v0 }
 0x33a   :  { %3922 = vmatpush3.bf16.msra.mxu1 %v3919_v27 }
 0x33b   :  { %3924 = vmatprep.subr.bf16.mxu1 %v3923_v31 }
 0x33e   :  { %3926 = vmatpush3.bf16.msra.mxu1 %v3923_v31  ;;  %v1140_v31 = vand.u32 4294901760, %v5130_v45 }
 0x33f   :  { %3928 = vmatprep.subr.bf16.mxu1 %v3927_v55  ;;  %3402 = vmatpush3.bf16.xpose.msra.mxu0 %v4482_v52  ;;  %v1146_v52 = vand.u32 4294901760, %v5145_v58 }
 0x340   :  { %3403 = vmatprep.subr.bf16.mxu0 %v5993_v0  ;;  %v5154_v23 = vpack.c.bf16 %v1140_v31, %v1137_v30 }
 0x342   :  { %3930 = vmatpush3.bf16.msra.mxu1 %v3927_v55  ;;  %v5141_v55 = vpack.c.bf16 %v1134_v46, %v1131_v4 }
 0x343   :  { %3932 = vmatprep.subr.bf16.mxu1 %v4880_v59 }
 0x346   :  { %3934 = vmatpush3.bf16.msra.mxu1 %v4880_v59  ;;  %v4484_v59 = vld [vmem:[#allocation7 + $0x78] sm:$0xff]  }
 0x347   :  { %3936 = vmatprep.subr.bf16.mxu1 %v4884_v60  ;;  %3404 = vmatpush3.bf16.xpose.msra.mxu0 %v4483_v54  ;;  %v5158_v54 = vld [vmem:[#allocation5 + $0xc0] sm:$0xff] }
 0x348   :  { %3405 = vmatprep.subr.bf16.mxu0 %v5993_v0 }
 0x34a   :  { %3938 = vmatpush3.bf16.msra.mxu1 %v4884_v60  ;;  %v3979_v60 = vpack.c.bf16 %v354_v20, %v347_v19  ;;  %v6010_v19 = vand.u32 4294901760, %v4818_v28  ;;  %v6011_v20 = vand.u32 4294901760, %v4820_v29  ;;  %v6016_v28 = vand.u32 4294901760, %v4855_v25 }
 0x34b   :  { %3940 = vmatprep.subr.bf16.mxu1 %v4888_v1  ;;  %v6017_v29 = vand.u32 4294901760, %v4857_v26 }
 0x34d   :  { %v4007_v36 = vpack.c.bf16 %v6017_v29, %v6016_v28  ;;  %v1119_v28 = vld [vmem:[#allocation5 + $0xd8] sm:$0xff] }
 0x34e   :  { %3942 = vmatpush3.bf16.msra.mxu1 %v4888_v1  ;;  %v3983_v1 = vpack.c.bf16 %v368_v8, %v361_v53  ;;  %v3995_v8 = vpack.c.bf16 %v6011_v20, %v6010_v19  ;;  %v6014_v53 = vand.u32 4294901760, %v4844_v61 }
 0x34f   :  { %3944 = vmatprep.subr.bf16.mxu1 %v4892_v2  ;;  %3406 = vmatpush3.bf16.xpose.msra.mxu0 %v4484_v59  ;;  %v5160_v59 = vld [vmem:[#allocation5 + $0xc8] sm:$0xff] }
 0x350   :  { %v4003_v33 = vpack.c.bf16 %v6015_v3, %v6014_v53 }
 0x352   :  { %3946 = vmatpush3.bf16.msra.mxu1 %v4892_v2  ;;  %v6012_v2 = vand.u32 4294901760, %v4830_v35 }
 0x353   :  { %3948 = vmatprep.subr.bf16.mxu1 %v4745_v41 }
 0x354   :  { %v3999_v32 = vpack.c.bf16 %v6013_v7, %v6012_v2 }
 0x355   :  { %3284 = vmatmul.mubr.f32.vlgmr.msra.gmra.mrb[0].mxu1 %v4955_v37  ;;  %v1108_v37 = vld [vmem:[#allocation5 + $0x80] sm:$0xff] }
 0x356   :  { %3950 = vmatpush3.bf16.msra.mxu1 %v4745_v41  ;;  %3318 = vmatprep.mubr.f32.mxu1 %v326_v11  ;;  %v1125_v38 = vand.u32 4294901760, %v1108_v37 }
 0x357   :  { %3952 = vmatprep.subr.bf16.mxu1 %v4753_v44 }
 0x35a   :  { %3954 = vmatpush3.bf16.msra.mxu1 %v4753_v44 }
 0x35b   :  { %3956 = vmatprep.subr.bf16.mxu1 %v4766_v47 }
 0x35e   :  { %3958 = vmatpush3.bf16.msra.mxu1 %v4766_v47 }
 0x35f   :  { %3960 = vmatprep.subr.bf16.mxu1 %v4776_v50 }
 0x362   :  { %3962 = vmatpush3.bf16.msra.mxu1 %v4776_v50 }
 0x363   :  { %3964 = vmatprep.subr.bf16.mxu1 %v4787_v63 }
 0x366   :  { %3966 = vmatpush3.bf16.msra.mxu1 %v4787_v63 }
 0x367   :  { %3968 = vmatprep.subr.bf16.mxu1 %v4791_v5 }
 0x36a   :  { %3970 = vmatpush3.bf16.msra.mxu1 %v4791_v5 }
 0x36b   :  { %3972 = vmatprep.subr.bf16.mxu1 %v4795_v12 }
 0x36e   :  { %3974 = vmatpush3.bf16.msra.mxu1 %v4795_v12 }
 0x36f   :  { %3976 = vmatprep.subr.bf16.mxu1 %v4805_v21 }
 0x372   :  { %3978 = vmatpush3.bf16.msra.mxu1 %v4805_v21 }
 0x373   :  { %3980 = vmatprep.subr.bf16.mxu1 %v3979_v60 }
 0x375   :  { %3319 = vmatmul.mubr.f32.vlgmr.msra.gmra.mrb[0].mxu1 %v336_v49  ;;  %v1109_v49 = vld [vmem:[#allocation5 + $0x88] sm:$0xff] }
 0x376   :  { %3982 = vmatpush3.bf16.msra.mxu1 %v3979_v60  ;;  %3353 = vmatprep.mubr.msk.f32.mxu1 %vm221_vm5, %v4622_v48  ;;  %v1128_v39 = vand.u32 4294901760, %v1109_v49  ;;  %v5168_v60 = vpack.c.bf16 %v1146_v52, %v1143_v16 }
 0x377   :  { %3984 = vmatprep.subr.bf16.mxu1 %v3983_v1 }
 0x378   :  { %v5133_v27 = vpack.c.bf16 %v1128_v39, %v1125_v38 }
 0x37a   :  { %3986 = vmatpush3.bf16.msra.mxu1 %v3983_v1  ;;  %4044 = vmatprep.subr.bf16.mxu0 %v5133_v27  ;;  %v1149_v1 = vand.u32 4294901760, %v5158_v54 }
 0x37b   :  { %3988 = vmatprep.subr.bf16.mxu1 %v3987_v13 }
 0x37e   :  { %3990 = vmatpush3.bf16.msra.mxu1 %v3987_v13  ;;  %v1152_v13 = vand.u32 4294901760, %v5160_v59 }
 0x37f   :  { %3992 = vmatprep.subr.bf16.mxu1 %v3991_v14 }
 0x382   :  { %3994 = vmatpush3.bf16.msra.mxu1 %v3991_v14  ;;  %v5178_v14 = vpack.c.bf16 %v1152_v13, %v1149_v1 }
 0x383   :  { %3996 = vmatprep.subr.bf16.mxu1 %v3995_v8 }
 0x386   :  { %3998 = vmatpush3.bf16.msra.mxu1 %v3995_v8 }
 0x387   :  { %4000 = vmatprep.subr.bf16.mxu1 %v3999_v32 }
 0x38a   :  { %4002 = vmatpush3.bf16.msra.mxu1 %v3999_v32 }
 0x38b   :  { %4004 = vmatprep.subr.bf16.mxu1 %v4003_v33 }
 0x38e   :  { %4006 = vmatpush3.bf16.msra.mxu1 %v4003_v33  ;;  %v1118_v33 = vld [vmem:[#allocation5 + $0xd0] sm:$0xff] }
 0x38f   :  { %4008 = vmatprep.subr.bf16.mxu1 %v4007_v36  ;;  %v1155_v29 = vand.u32 4294901760, %v1118_v33 }
 0x392   :  { %4010 = vmatpush3.bf16.msra.mxu1 %v4007_v36  ;;  %v1158_v36 = vand.u32 4294901760, %v1119_v28 }
 0x393   :  { %4012 = vmatprep.subr.bf16.mxu1 %v4745_v41 }
 0x395   :  { %3354 = vmatmul.mubr.msk.f32.vlgmr.msra.gmra.mrb[0].mxu1 %vm222_vm6, %v4622_v48 }
 0x396   :  { %4014 = vmatpush3.bf16.msra.mxu1 %v4745_v41  ;;  %3388 = vmatprep.mubr.msk.f32.mxu1 %vm221_vm5, %v4622_v48 }
 0x397   :  { %4016 = vmatprep.subr.bf16.mxu1 %v4753_v44 }
 0x39a   :  { %4018 = vmatpush3.bf16.msra.mxu1 %v4753_v44 }
 0x39b   :  { %4020 = vmatprep.subr.bf16.mxu1 %v4766_v47 }
 0x39e   :  { %4022 = vmatpush3.bf16.msra.mxu1 %v4766_v47 }
 0x39f   :  { %4024 = vmatprep.subr.bf16.mxu1 %v4776_v50 }
 0x3a2   :  { %4026 = vmatpush3.bf16.msra.mxu1 %v4776_v50 }
 0x3a3   :  { %4028 = vmatprep.subr.bf16.mxu1 %v4787_v63 }
 0x3a6   :  { %4030 = vmatpush3.bf16.msra.mxu1 %v4787_v63 }
 0x3a7   :  { %4032 = vmatprep.subr.bf16.mxu1 %v4791_v5 }
 0x3aa   :  { %4034 = vmatpush3.bf16.msra.mxu1 %v4791_v5 }
 0x3ab   :  { %4036 = vmatprep.subr.bf16.mxu1 %v4795_v12 }
 0x3ae   :  { %4038 = vmatpush3.bf16.msra.mxu1 %v4795_v12  ;;  %v2783_v12 = vld [vmem:[%s5976_s3 + $0x1] ss:$0 sm:$0xff] }
 0x3af   :  { %4040 = vmatprep.subr.bf16.mxu1 %v4805_v21 }
 0x3b2   :  { %4042 = vmatpush3.bf16.msra.mxu1 %v4805_v21 }
 0x3b5   :  { %3389 = vmatmul.mubr.msk.f32.vlgmr.msra.gmra.mrb[0].mxu1 %vm222_vm6, %v4622_v48 }
 0x488   :  { %v5104_v41 = vpop.f32.mrb[0].mxu1 }
 0x489   :  { %v5108_v44 = vsub.f32 %v4721_v10, %v5104_v41  ;;  %v5110_v47 = vpop.f32.mrb[1].mxu1 }
 0x48a   :  { %v5114_v50 = vsub.f32 %v4719_v9, %v5110_v47 }
 0x48c   :  { %v965_v63 = vpack.c.bf16 %v5108_v44, %v5114_v50 }
 0x48e   :  { %3408 = vmatmul.mubr.bf16.vlgmr.msra.gmra.mrb[4].mxu0 %v965_v63  ;;  %v5189_v63 = vpack.c.bf16 %v1158_v36, %v1155_v29 }
 0x48f   :  { %4046 = vmatpush3.bf16.msra.mxu0 %v5133_v27 }
 0x490   :  { %4048 = vmatprep.subr.bf16.mxu0 %v5141_v55 }
 0x493   :  { %4050 = vmatpush3.bf16.msra.mxu0 %v5141_v55 }
 0x494   :  { %4052 = vmatprep.subr.bf16.mxu0 %v5154_v23 }
 0x497   :  { %4054 = vmatpush3.bf16.msra.mxu0 %v5154_v23 }
 0x498   :  { %4056 = vmatprep.subr.bf16.mxu0 %v5168_v60 }
 0x49b   :  { %4058 = vmatpush3.bf16.msra.mxu0 %v5168_v60 }
 0x49c   :  { %4060 = vmatprep.subr.bf16.mxu0 %v5178_v14 }
 0x49f   :  { %4062 = vmatpush3.bf16.msra.mxu0 %v5178_v14 }
 0x4a0   :  { %4064 = vmatprep.subr.bf16.mxu0 %v5189_v63 }
 0x4a3   :  { %4066 = vmatpush3.bf16.msra.mxu0 %v5189_v63 }
 0x561   :  { %v1048_v5 = vpop.f32.mrb[4].mxu0 }
 0x562   :  { %v1055_v21 = vmul.f32 2.0, %v1048_v5  ;;  %v3409_v35 = vpop.f32.mrb[5].mxu0  ;;  %v1120_v5 = vld [vmem:[#allocation5 + $0xe0] sm:$0xff] }
 0x563   :  { %v1051_v51 = vpop.f32.mrb[6].mxu0 }
 0x564   :  { %v1056_v10 = vmul.f32 2.0, %v1051_v51  ;;  %v3410_v61 = vpop.f32.mrb[7].mxu0  ;;  %v1063_v62 = vsub.f32 %v2783_v12, %v1055_v21  ;;  %v1161_v21 = vand.u32 4294901760, %v1120_v5 }
 0x565   :  { %v5197_v61 = vsub.f32 %v1109_v49, %v1128_v39  ;;  %v5218_v39 = vsub.f32 %v1119_v28, %v1158_v36 }
 0x566   :  { %1065 = vmin.xlane.f32.xlu0 %v1063_v62  ;;  %v1064_v25 = vsub.f32 %v2783_v12, %v1056_v10  ;;  %v1121_v12 = vld [vmem:[#allocation5 + $0xe8] sm:$0xff]  ;;  %v5195_v10 = vsub.f32 %v1108_v37, %v1125_v38  ;;  %v5216_v38 = vsub.f32 %v1118_v33, %v1155_v29 }
 0x567   :  { %v1164_v35 = vand.u32 4294901760, %v1121_v12 }
 0x568   :  { %1067 = vmin.xlane.f32.xlu1 %v1064_v25 }
 0x569   :  { %v5193_v51 = vpack.c.bf16 %v1164_v35, %v1161_v21 }
 0x56b   :  { %4068 = vmatprep.subr.bf16.mxu0 %v5193_v51 }
 0x56c   :  { %4070 = vmatpush3.bf16.msra.mxu0 %v5193_v51 }
 0x5f3   :  { %v1066_v9 = vpop.xlane.xlu0 %1065 }
 0x5f4   :  { %vm1069_vm7 = vcmp.le.f32.partialorder %v1063_v62, %v1066_v9  ;;  %v1122_v62 = vld [vmem:[#allocation5 + $0xf0] sm:$0xff] }
 0x5f5   :  { %v1071_v26 = vsel %vm1069_vm7, %v4731_v22, 128  ;;  %v1068_v6 = vpop.xlane.xlu1 %1067  ;;  %v1167_v9 = vand.u32 4294901760, %v1122_v62 }
 0x5f6   :  { %vm1070_vm8 = vcmp.le.f32.partialorder %v1064_v25, %v1068_v6  ;;  %v1074_v42 = vshra.s32 %v1071_v26, 16  ;;  %v1073_v19 = vand.u32 65535, %v1071_v26  ;;  %v1123_v25 = vld [vmem:[#allocation5 + $0xf8] sm:$0xff]  ;;  %v1228_v6 = vand.u32 4294901760, %v5195_v10 }
 0x5f7   :  { %v1072_v43 = vsel %vm1070_vm8, %v4731_v22, 128  ;;  %v1170_v26 = vand.u32 4294901760, %v1123_v25 }
 0x5f8   :  { %v1076_v11 = vcvt.s32.f32 %v1074_v42  ;;  %v1088_v34 = vshra.s32 %v1072_v43, 16  ;;  %v1087_v20 = vand.u32 65535, %v1072_v43  ;;  %v1075_v2 = vcvt.s32.f32 %v1073_v19 }
 0x5f9   :  { %v6000_v42 = vand.u32 4294901760, %v5197_v61  ;;  %v5203_v43 = vpack.c.bf16 %v1170_v26, %v1167_v9  ;;  %v5995_v19 = vand.u32 4294901760, %v5216_v38 }
 0x5fa   :  { %1077 = vmin.xlane.f32.xlu0 %v1076_v11  ;;  %v1090_v15 = vcvt.s32.f32 %v1088_v34  ;;  %v1089_v53 = vcvt.s32.f32 %v1087_v20  ;;  %v5992_v20 = vand.u32 4294901760, %v5218_v39 }
 0x5fb   :  { %v1236_v34 = vsub.f32 %v5197_v61, %v6000_v42  ;;  %4072 = vmatprep.subr.bf16.mxu0 %v5203_v43 }
 0x5fc   :  { %1091 = vmin.xlane.f32.xlu1 %v1090_v15  ;;  %4074 = vmatpush3.bf16.msra.mxu0 %v5203_v43 }
 0x5fd   :  { %v1237_v37 = vand.u32 4294901760, %v1236_v34 }
 0x687   :  { %v5183_v8 = vpop.xlane.xlu0 %1077 }
 0x688   :  { %vm1079_vm9 = vcmp.eq.f32.partialorder %v1076_v11, %v5183_v8  ;;  %v1229_v11 = vsub.f32 %v5195_v10, %v1228_v6 }
 0x689   :  { %v5186_v7 = vpop.xlane.xlu1 %1091  ;;  %v1080_v32 = vsel %vm1079_vm9, %v1075_v2, inf  ;;  %v1299_v2 = vsub.f32 %v5216_v38, %v5995_v19 }
 0x68a   :  { %1081 = vmin.xlane.f32.xlu0 %v1080_v32  ;;  %vm1093_vm10 = vcmp.eq.f32.partialorder %v1090_v15, %v5186_v7  ;;  %v1230_v15 = vand.u32 4294901760, %v1229_v11  ;;  %v1306_v32 = vsub.f32 %v5218_v39, %v5992_v20 }
 0x68b   :  { %v1094_v3 = vsel %vm1093_vm10, %v1089_v53, inf  ;;  %v5228_v53 = vsub.f32 %v1120_v5, %v1161_v21  ;;  %v1300_v33 = vand.u32 4294901760, %v1299_v2 }
 0x68c   :  { %1095 = vmin.xlane.f32.xlu1 %v1094_v3  ;;  %v5213_v49 = vpack.c.bf16 %v1237_v37, %v1230_v15  ;;  %v5230_v3 = vsub.f32 %v1121_v12, %v1164_v35  ;;  %v1307_v29 = vand.u32 4294901760, %v1306_v32  ;;  %v5239_v15 = vsub.f32 %v1122_v62, %v1167_v9 }
 0x68d   :  { %v5991_v28 = vand.u32 4294901760, %v5228_v53  ;;  %v5241_v37 = vsub.f32 %v1123_v25, %v1170_v26 }
 0x68e   :  { %4076 = vmatprep.subr.bf16.mxu0 %v5213_v49  ;;  %v5990_v36 = vand.u32 4294901760, %v5230_v3  ;;  %v5234_v11 = vpack.c.bf16 %v1307_v29, %v1300_v33  ;;  %v5989_v21 = vand.u32 4294901760, %v5239_v15  ;;  %v5260_v29 = vpack.c.bf16 %v5197_v61, %v5195_v10 }
 0x68f   :  { %v1313_v34 = vsub.f32 %v5228_v53, %v5991_v28  ;;  %v5988_v35 = vand.u32 4294901760, %v5241_v37 }
 0x690   :  { %v1320_v5 = vsub.f32 %v5230_v3, %v5990_v36  ;;  %v1327_v32 = vsub.f32 %v5239_v15, %v5989_v21 }
 0x691   :  { %v1314_v12 = vand.u32 4294901760, %v1313_v34  ;;  %v1334_v62 = vsub.f32 %v5241_v37, %v5988_v35  ;;  %v5264_v34 = vpack.c.bf16 %v5218_v39, %v5216_v38 }
 0x692   :  { %v1321_v2 = vand.u32 4294901760, %v1320_v5  ;;  %v1328_v9 = vand.u32 4294901760, %v1327_v32  ;;  %v5268_v5 = vpack.c.bf16 %v5230_v3, %v5228_v53  ;;  %v1084_v32 = vcvt.f32.s32 %v5183_v8 }
 0x693   :  { %v1335_v26 = vand.u32 4294901760, %v1334_v62  ;;  %v5283_v62 = vsub.f32 %v5125_v40, %v1134_v46  ;;  %v5296_v40 = vsub.f32 %v5130_v45, %v1140_v31 }
 0x694   :  { %v5254_v25 = vpack.c.bf16 %v1321_v2, %v1314_v12  ;;  %v5272_v12 = vpack.c.bf16 %v5241_v37, %v5239_v15  ;;  %v5277_v2 = vsub.f32 %v5123_v17, %v1131_v4  ;;  %v1085_v21 = vshll.u32 %v1084_v32, 16 }
 0x695   :  { %v5256_v33 = vpack.c.bf16 %v1335_v26, %v1328_v9  ;;  %v1098_v9 = vcvt.f32.s32 %v5186_v7  ;;  %v5998_v28 = vand.u32 4294901760, %v5283_v62  ;;  %v5291_v17 = vsub.f32 %v5128_v56, %v1137_v30 }
 0x696   :  { %v5999_v35 = vand.u32 4294901760, %v5277_v2  ;;  %v5996_v31 = vand.u32 4294901760, %v5296_v40 }
 0x697   :  { %v1099_v46 = vshll.u32 %v1098_v9, 16  ;;  %v1250_v56 = vsub.f32 %v5283_v62, %v5998_v28  ;;  %v5997_v45 = vand.u32 4294901760, %v5291_v17  ;;  %v6021_v10 = vand.u32 4294901760, %v5291_v17 }
 0x698   :  { %v1243_v32 = vsub.f32 %v5277_v2, %v5999_v35 }
 0x717   :  { %v1082_v26 = vpop.xlane.xlu0 %1081 }
 0x718   :  { %v1083_v36 = vcvt.f32.s32 %v1082_v26 }
 0x719   :  { %v1096_v4 = vpop.xlane.xlu1 %1095 }
 0x71a   :  { %v5298_v8 = vadd.s32 %v1085_v21, %v1083_v36  ;;  %v1097_v7 = vcvt.f32.s32 %v1096_v4  ;;  %v5319_v36 = vsub.f32 %v5143_v57, %v1143_v16  ;;  %v5324_v21 = vsub.f32 %v5145_v58, %v1146_v52 }
 0x71b   :  { %v1244_v16 = vand.u32 4294901760, %v1243_v32  ;;  %v1257_v58 = vsub.f32 %v5291_v17, %v5997_v45  ;;  %v1264_v52 = vsub.f32 %v5296_v40, %v5996_v31  ;;  %v5352_v32 = vsub.f32 %v5158_v54, %v1149_v1 }
 0x71c   :  { %vm1101_vm11 = vcmp.eq.s32.totalorder %v4731_v22, %v5298_v8  ;;  %v5305_v26 = vadd.s32 %v1099_v46, %v1097_v7  ;;  %v1251_v7 = vand.u32 4294901760, %v1250_v56  ;;  %v1277_v20 = vand.u32 4294901760, %v5324_v21 }
 0x71d   :  { %v2784_v30 = vsel %vm1101_vm11, 1.0, %v5993_v0  ;;  %v5357_v56 = vsub.f32 %v5160_v59, %v1152_v13  ;;  %v1258_v28 = vand.u32 4294901760, %v1257_v58  ;;  %v1265_v35 = vand.u32 4294901760, %v1264_v52 }
 0x71e   :  { %v5326_v9 = vsub.f32 %v2784_v30, %v2784_v30  ;;  %vm1102_vm12 = vcmp.eq.s32.totalorder %v4731_v22, %v5305_v26  ;;  %v1270_v30 = vand.u32 4294901760, %v5319_v36  ;;  %v4079_v45 = vpack.c.bf16 %v1251_v7, %v1244_v16 }
 0x71f   :  { %v2785_v4 = vsel %vm1102_vm12, 1.0, %v5993_v0  ;;  %v1278_v1 = vsub.f32 %v5324_v21, %v1277_v20  ;;  %v1284_v59 = vand.u32 4294901760, %v5352_v32  ;;  %v1291_v13 = vand.u32 4294901760, %v5357_v56 }
 0x720   :  { %v5334_v46 = vsub.f32 %v2785_v4, %v2785_v4  ;;  %v1207_v57 = vand.u32 4294901760, %v5326_v9  ;;  %v1271_v42 = vsub.f32 %v5319_v36, %v1270_v30  ;;  %v4083_v16 = vpack.c.bf16 %v1265_v35, %v1258_v28 }
 0x721   :  { %v1285_v7 = vsub.f32 %v5352_v32, %v1284_v59  ;;  %v1292_v58 = vsub.f32 %v5357_v56, %v1291_v13  ;;  %v4115_v28 = vpack.c.bf16 %v5296_v40, %v5291_v17  ;;  %v4123_v35 = vpack.c.bf16 %v5357_v56, %v5352_v32  ;;  %v2801_v32 = vld [vmem:[%s5976_s3 + $0x2] ss:$0 sm:$0xff] }
 0x722   :  { %v1208_v4 = vsub.f32 %v5326_v9, %v1207_v57  ;;  %v1217_v0 = vand.u32 4294901760, %v5334_v46 }
 0x723   :  { %v1286_v52 = vand.u32 4294901760, %v1285_v7 }
 0x724   :  { %v1209_v19 = vand.u32 4294901760, %v1208_v4  ;;  %v1218_v31 = vsub.f32 %v5334_v46, %v1217_v0  ;;  %v1293_v4 = vand.u32 4294901760, %v1292_v58 }
 0x726   :  { %3443 = vmatprep.mubr.f32.mxu0 %v1209_v19  ;;  %v1219_v54 = vand.u32 4294901760, %v1218_v31  ;;  %v1272_v19 = vand.u32 4294901760, %v1271_v42  ;;  %v1279_v31 = vand.u32 4294901760, %v1278_v1  ;;  %v4111_v42 = vpack.c.bf16 %v5283_v62, %v5277_v2 }
 0x728   :  { %3444 = vmatmul.mubr.f32.vlgmr.msra.gmra.mrb[8].mxu0 %v1219_v54  ;;  %v4091_v54 = vpack.c.bf16 %v1293_v4, %v1286_v52 }
 0x729   :  { %4078 = vmatpush3.bf16.msra.mxu0 %v5213_v49  ;;  %3478 = vmatprep.mubr.msk.f32.mxu0 %vm1101_vm11, %v4622_v48  ;;  %v4087_v49 = vpack.c.bf16 %v1279_v31, %v1272_v19 }
 0x72a   :  { %4080 = vmatprep.subr.bf16.mxu0 %v4079_v45 }
 0x72d   :  { %4082 = vmatpush3.bf16.msra.mxu0 %v4079_v45 }
 0x72e   :  { %4084 = vmatprep.subr.bf16.mxu0 %v4083_v16 }
 0x731   :  { %4086 = vmatpush3.bf16.msra.mxu0 %v4083_v16 }
 0x732   :  { %4088 = vmatprep.subr.bf16.mxu0 %v4087_v49 }
 0x735   :  { %4090 = vmatpush3.bf16.msra.mxu0 %v4087_v49 }
 0x736   :  { %4092 = vmatprep.subr.bf16.mxu0 %v4091_v54 }
 0x739   :  { %4094 = vmatpush3.bf16.msra.mxu0 %v4091_v54 }
 0x73a   :  { %4096 = vmatprep.subr.bf16.mxu0 %v5234_v11 }
 0x73d   :  { %4098 = vmatpush3.bf16.msra.mxu0 %v5234_v11  ;;  %v4119_v11 = vpack.c.bf16 %v5324_v21, %v5319_v36  ;;  %v6027_v36 = vand.u32 4294901760, %v5239_v15  ;;  %v6028_v21 = vand.u32 4294901760, %v5241_v37 }
 0x73e   :  { %4100 = vmatprep.subr.bf16.mxu0 %v5254_v25 }
 0x741   :  { %4102 = vmatpush3.bf16.msra.mxu0 %v5254_v25  ;;  %v6018_v25 = vand.u32 4294901760, %v5197_v61  ;;  %v6022_v61 = vand.u32 4294901760, %v5296_v40  ;;  %v6025_v40 = vand.u32 4294901760, %v5228_v53 }
 0x742   :  { %4104 = vmatprep.subr.bf16.mxu0 %v5256_v33 }
 0x745   :  { %4106 = vmatpush3.bf16.msra.mxu0 %v5256_v33  ;;  %v4171_v33 = vpack.c.bf16 %v6018_v25, %v1228_v6  ;;  %v4179_v6 = vpack.c.bf16 %v6022_v61, %v6021_v10  ;;  %v5534_v25 = vld [vmem:[#allocation5 + $0x110] sm:$0xff]  ;;  %v5541_v10 = vld [vmem:[#allocation5 + $0x120] sm:$0xff]  ;;  %v5543_v61 = vld [vmem:[#allocation5 + $0x128] sm:$0xff] }
 0x746   :  { %4108 = vmatprep.subr.bf16.mxu0 %v5260_v29 }
 0x748   :  { %3479 = vmatmul.mubr.msk.f32.vlgmr.msra.gmra.mrb[8].mxu0 %vm1102_vm12, %v4622_v48 }
 0x749   :  { %4110 = vmatpush3.bf16.msra.mxu0 %v5260_v29  ;;  %3513 = vmatprep.mubr.f32.mxu0 %v5326_v9  ;;  %v6019_v29 = vand.u32 4294901760, %v5277_v2  ;;  %v6023_v2 = vand.u32 4294901760, %v5216_v38  ;;  %v4199_v9 = vpack.c.bf16 %v6028_v21, %v6027_v36  ;;  %v4492_v38 = vld [vmem:[#allocation7 + $0xb8] sm:$0xff]   ;;  %v5575_v21 = vld [vmem:[#allocation5 + $0x140] sm:$0xff] }
 0x74a   :  { %4112 = vmatprep.subr.bf16.mxu0 %v4111_v42 }
 0x74d   :  { %4114 = vmatpush3.bf16.msra.mxu0 %v4111_v42 }
 0x74e   :  { %4116 = vmatprep.subr.bf16.mxu0 %v4115_v28 }
 0x751   :  { %4118 = vmatpush3.bf16.msra.mxu0 %v4115_v28 }
 0x752   :  { %4120 = vmatprep.subr.bf16.mxu0 %v4119_v11 }
 0x755   :  { %4122 = vmatpush3.bf16.msra.mxu0 %v4119_v11  ;;  %v5530_v11 = vld [vmem:[#allocation5 + $0x100] sm:$0xff] }
 0x756   :  { %4124 = vmatprep.subr.bf16.mxu0 %v4123_v35 }
 0x759   :  { %4126 = vmatpush3.bf16.msra.mxu0 %v4123_v35  ;;  %v5532_v35 = vld [vmem:[#allocation5 + $0x108] sm:$0xff] }
 0x75a   :  { %4128 = vmatprep.subr.bf16.mxu0 %v5264_v34 }
 0x75d   :  { %4130 = vmatpush3.bf16.msra.mxu0 %v5264_v34  ;;  %v6020_v34 = vand.u32 4294901760, %v5283_v62  ;;  %v6024_v62 = vand.u32 4294901760, %v5218_v39 }
 0x75e   :  { %4132 = vmatprep.subr.bf16.mxu0 %v5268_v5 }
 0x75f   :  { %v4191_v17 = vpack.c.bf16 %v6024_v62, %v6023_v2  ;;  %v2021_v2 = vand.u32 4294901760, %v5543_v61 }
 0x761   :  { %4134 = vmatpush3.bf16.msra.mxu0 %v5268_v5  ;;  %v4175_v5 = vpack.c.bf16 %v6020_v34, %v6019_v29  ;;  %v2009_v29 = vand.u32 4294901760, %v5532_v35  ;;  %v5538_v34 = vld [vmem:[#allocation5 + $0x118] sm:$0xff] }
 0x762   :  { %4136 = vmatprep.subr.bf16.mxu0 %v5272_v12 }
 0x765   :  { %4138 = vmatpush3.bf16.msra.mxu0 %v5272_v12  ;;  %v4183_v12 = vpack.c.bf16 %v1277_v20, %v1270_v30  ;;  %v6026_v20 = vand.u32 4294901760, %v5230_v3 }
 0x766   :  { %4140 = vmatprep.subr.bf16.mxu0 %v5133_v27 }
 0x767   :  { %v4195_v45 = vpack.c.bf16 %v6026_v20, %v6025_v40  ;;  %v5562_v40 = vld [vmem:[#allocation5 + $0x138] sm:$0xff] }
 0x768   :  { %3514 = vmatmul.mubr.f32.vlgmr.msra.gmra.mrb[8].mxu0 %v5334_v46  ;;  %v2027_v36 = vand.u32 4294901760, %v5562_v40 }
 0x769   :  { %4142 = vmatpush3.bf16.msra.mxu0 %v5133_v27  ;;  %3548 = vmatprep.mubr.f32.mxu0 %v1207_v57 }
 0x76a   :  { %4144 = vmatprep.subr.bf16.mxu0 %v5141_v55 }
 0x76d   :  { %4146 = vmatpush3.bf16.msra.mxu0 %v5141_v55 }
 0x76e   :  { %4148 = vmatprep.subr.bf16.mxu0 %v5154_v23 }
 0x771   :  { %4150 = vmatpush3.bf16.msra.mxu0 %v5154_v23 }
 0x772   :  { %4152 = vmatprep.subr.bf16.mxu0 %v5168_v60 }
 0x775   :  { %4154 = vmatpush3.bf16.msra.mxu0 %v5168_v60 }
 0x776   :  { %4156 = vmatprep.subr.bf16.mxu0 %v5178_v14 }
 0x779   :  { %4158 = vmatpush3.bf16.msra.mxu0 %v5178_v14 }
 0x77a   :  { %4160 = vmatprep.subr.bf16.mxu0 %v5189_v63 }
 0x77d   :  { %4162 = vmatpush3.bf16.msra.mxu0 %v5189_v63 }
 0x77e   :  { %4164 = vmatprep.subr.bf16.mxu0 %v5193_v51 }
 0x781   :  { %4166 = vmatpush3.bf16.msra.mxu0 %v5193_v51 }
 0x782   :  { %4168 = vmatprep.subr.bf16.mxu0 %v5203_v43 }
 0x785   :  { %4170 = vmatpush3.bf16.msra.mxu0 %v5203_v43 }
 0x786   :  { %4172 = vmatprep.subr.bf16.mxu0 %v4171_v33 }
 0x788   :  { %3549 = vmatmul.mubr.f32.vlgmr.msra.gmra.mrb[8].mxu0 %v1217_v0  ;;  %v4187_v0 = vpack.c.bf16 %v1291_v13, %v1284_v59 }
 0x789   :  { %4174 = vmatpush3.bf16.msra.mxu0 %v4171_v33  ;;  %3583 = vmatprep.mubr.msk.f32.mxu0 %vm1101_vm11, %v4622_v48  ;;  %v2006_v33 = vand.u32 4294901760, %v5530_v11 }
 0x78a   :  { %4176 = vmatprep.subr.bf16.mxu0 %v4175_v5 }
 0x78d   :  { %4178 = vmatpush3.bf16.msra.mxu0 %v4175_v5  ;;  %v2012_v5 = vand.u32 4294901760, %v5534_v25 }
 0x78e   :  { %4180 = vmatprep.subr.bf16.mxu0 %v4179_v6 }
 0x791   :  { %4182 = vmatpush3.bf16.msra.mxu0 %v4179_v6  ;;  %v2015_v6 = vand.u32 4294901760, %v5538_v34 }
 0x792   :  { %4184 = vmatprep.subr.bf16.mxu0 %v4183_v12 }
 0x793   :  { %v5558_v62 = vpack.c.bf16 %v2015_v6, %v2012_v5 }
 0x795   :  { %4186 = vmatpush3.bf16.msra.mxu0 %v4183_v12  ;;  %v5550_v12 = vpack.c.bf16 %v2009_v29, %v2006_v33 }
 0x796   :  { %4188 = vmatprep.subr.bf16.mxu0 %v4187_v0 }
 0x797   :  { %4236 = vmatprep.subr.bf16.mxu1 %v5550_v12 }
 0x798   :  { %4238 = vmatpush3.bf16.msra.mxu1 %v5550_v12 }
 0x799   :  { %4190 = vmatpush3.bf16.msra.mxu0 %v4187_v0  ;;  %v2018_v0 = vand.u32 4294901760, %v5541_v10  ;;  %4240 = vmatprep.subr.bf16.mxu1 %v5558_v62 }
 0x79a   :  { %4192 = vmatprep.subr.bf16.mxu0 %v4191_v17 }
 0x79b   :  { %v5571_v20 = vpack.c.bf16 %v2021_v2, %v2018_v0 }
 0x79c   :  { %4242 = vmatpush3.bf16.msra.mxu1 %v5558_v62 }
 0x79d   :  { %4194 = vmatpush3.bf16.msra.mxu0 %v4191_v17  ;;  %v5560_v17 = vld [vmem:[#allocation5 + $0x130] sm:$0xff]  ;;  %4244 = vmatprep.subr.bf16.mxu1 %v5571_v20 }
 0x79e   :  { %4196 = vmatprep.subr.bf16.mxu0 %v4195_v45 }
 0x7a0   :  { %4246 = vmatpush3.bf16.msra.mxu1 %v5571_v20 }
 0x7a1   :  { %4198 = vmatpush3.bf16.msra.mxu0 %v4195_v45  ;;  %v2024_v45 = vand.u32 4294901760, %v5560_v17 }
 0x7a2   :  { %4200 = vmatprep.subr.bf16.mxu0 %v4199_v9 }
 0x7a5   :  { %4202 = vmatpush3.bf16.msra.mxu0 %v4199_v9  ;;  %v5577_v9 = vld [vmem:[#allocation5 + $0x148] sm:$0xff] }
 0x7a6   :  { %4204 = vmatprep.subr.bf16.mxu0 %v5133_v27 }
 0x7a8   :  { %3584 = vmatmul.mubr.msk.f32.vlgmr.msra.gmra.mrb[8].mxu0 %vm1102_vm12, %v4622_v48 }
 0x7a9   :  { %4206 = vmatpush3.bf16.msra.mxu0 %v5133_v27  ;;  %3618 = vmatprep.mubr.msk.f32.mxu0 %vm1101_vm11, %v4622_v48  ;;  %v6029_v27 = vmov 0.0  }
 0x7aa   :  { %4208 = vmatprep.subr.bf16.mxu0 %v5141_v55 }
 0x7ad   :  { %4210 = vmatpush3.bf16.msra.mxu0 %v5141_v55  ;;  %v4485_v55 = vld [vmem:[#allocation7 + $0x80] sm:$0xff]  }
 0x7ae   :  { %4212 = vmatprep.subr.bf16.mxu0 %v5154_v23 }
 0x7b1   :  { %4214 = vmatpush3.bf16.msra.mxu0 %v5154_v23  ;;  %v4486_v23 = vld [vmem:[#allocation7 + $0x88] sm:$0xff]  }
 0x7b2   :  { %4216 = vmatprep.subr.bf16.mxu0 %v5168_v60 }
 0x7b5   :  { %4218 = vmatpush3.bf16.msra.mxu0 %v5168_v60  ;;  %v4487_v60 = vld [vmem:[#allocation7 + $0x90] sm:$0xff]  }
 0x7b6   :  { %4220 = vmatprep.subr.bf16.mxu0 %v5178_v14 }
 0x7b9   :  { %4222 = vmatpush3.bf16.msra.mxu0 %v5178_v14  ;;  %v4488_v14 = vld [vmem:[#allocation7 + $0x98] sm:$0xff]  }
 0x7ba   :  { %4224 = vmatprep.subr.bf16.mxu0 %v5189_v63 }
 0x7bd   :  { %4226 = vmatpush3.bf16.msra.mxu0 %v5189_v63  ;;  %v4489_v63 = vld [vmem:[#allocation7 + $0xa0] sm:$0xff]  }
 0x7be   :  { %4228 = vmatprep.subr.bf16.mxu0 %v5193_v51 }
 0x7c1   :  { %4230 = vmatpush3.bf16.msra.mxu0 %v5193_v51  ;;  %v4490_v51 = vld [vmem:[#allocation7 + $0xa8] sm:$0xff]  }
 0x7c2   :  { %4232 = vmatprep.subr.bf16.mxu0 %v5203_v43 }
 0x7c5   :  { %4234 = vmatpush3.bf16.msra.mxu0 %v5203_v43  ;;  %v4491_v43 = vld [vmem:[#allocation7 + $0xb0] sm:$0xff]  }
 0x7c6   :  { %3621 = vmatprep.subr.bf16.mxu0 %v6029_v27 }
 0x7c8   :  { %3619 = vmatmul.mubr.msk.f32.vlgmr.msra.gmra.mrb[8].mxu0 %vm1102_vm12, %v4622_v48 }
 0x7c9   :  { %3637 = vmatprep.mubr.msk.bf16.mxu0 %vm4621_vm0, %v6029_v27 }
 0x7ce   :  { %3622 = vmatpush3.bf16.xpose.msra.mxu0 %v4485_v55  ;;  %v5585_v55 = vpack.c.bf16 %v2027_v36, %v2024_v45 }
 0x7cf   :  { %3623 = vmatprep.subr.bf16.mxu0 %v6029_v27 }
 0x7d0   :  { %4248 = vmatprep.subr.bf16.mxu1 %v5585_v55 }
 0x7d1   :  { %4250 = vmatpush3.bf16.msra.mxu1 %v5585_v55 }
 0x7d6   :  { %3624 = vmatpush3.bf16.xpose.msra.mxu0 %v4486_v23  ;;  %v2030_v23 = vand.u32 4294901760, %v5575_v21 }
 0x7d7   :  { %3625 = vmatprep.subr.bf16.mxu0 %v6029_v27 }
 0x7de   :  { %3626 = vmatpush3.bf16.xpose.msra.mxu0 %v4487_v60  ;;  %v2033_v60 = vand.u32 4294901760, %v5577_v9 }
 0x7df   :  { %3627 = vmatprep.subr.bf16.mxu0 %v6029_v27 }
 0x7e6   :  { %3628 = vmatpush3.bf16.xpose.msra.mxu0 %v4488_v14  ;;  %v5595_v14 = vpack.c.bf16 %v2033_v60, %v2030_v23 }
 0x7e7   :  { %3629 = vmatprep.subr.bf16.mxu0 %v6029_v27 }
 0x7e8   :  { %4252 = vmatprep.subr.bf16.mxu1 %v5595_v14 }
 0x7e9   :  { %4254 = vmatpush3.bf16.msra.mxu1 %v5595_v14 }
 0x7ee   :  { %3630 = vmatpush3.bf16.xpose.msra.mxu0 %v4489_v63 }
 0x7ef   :  { %3631 = vmatprep.subr.bf16.mxu0 %v6029_v27 }
 0x7f6   :  { %3632 = vmatpush3.bf16.xpose.msra.mxu0 %v4490_v51 }
 0x7f7   :  { %3633 = vmatprep.subr.bf16.mxu0 %v6029_v27 }
 0x7fe   :  { %3634 = vmatpush3.bf16.xpose.msra.mxu0 %v4491_v43 }
 0x7ff   :  { %3635 = vmatprep.subr.bf16.mxu0 %v6029_v27 }
 0x806   :  { %3636 = vmatpush3.bf16.xpose.msra.mxu0 %v4492_v38 }
 0x89b   :  { %v5503_v39 = vpop.f32.mrb[8].mxu0 }
 0x89c   :  { %v5507_v53 = vadd.f32 %v5503_v39, %v5104_v41  ;;  %v5511_v3 = vsub.f32 %v5108_v44, %v5503_v39  ;;  %v5513_v15 = vpop.f32.mrb[9].mxu0 }
 0x89d   :  { %v5517_v37 = vsub.f32 %v5114_v50, %v5513_v15  ;;  %v5521_v46 = vadd.f32 %v5513_v15, %v5110_v47 }
 0x89f   :  { %v1846_v57 = vpack.c.bf16 %v5511_v3, %v5517_v37 }
 0x8a1   :  { %3638 = vmatmul.mubr.bf16.vlgmr.msra.gmra.mrb[12].mxu0 %v1846_v57  ;;  %v4493_v57 = vld [vmem:[#allocation2] sm:$0xff] }
 0x974   :  { %v1929_v30 = vpop.f32.mrb[12].mxu0 }
 0x975   :  { %v1936_v56 = vmul.f32 2.0, %v1929_v30  ;;  %v3639_v1 = vpop.f32.mrb[13].mxu0  ;;  %v927_v30 = vsub.f32 %v5110_v47, %v4493_v57  ;;  %v1809_v47 = vsub.f32 %v5503_v39, %v5108_v44  ;;  %v5621_v39 = vsub.f32 %v5530_v11, %v2006_v33  ;;  %v2004_v57 = vld [vmem:[#allocation5 + $0x178] sm:$0xff] }
 0x976   :  { %v1932_v59 = vpop.f32.mrb[14].mxu0 }
 0x977   :  { %v1937_v13 = vmul.f32 2.0, %v1932_v59  ;;  %v3640_v16 = vpop.f32.mrb[15].mxu0  ;;  %v1944_v19 = vsub.f32 %v2801_v32, %v1936_v56  ;;  %v4494_v59 = vld [vmem:[#allocation2 + $0x8] sm:$0xff] }
 0x979   :  { %1946 = vmin.xlane.f32.xlu0 %v1944_v19  ;;  %v1945_v31 = vsub.f32 %v2801_v32, %v1937_v13  ;;  %v928_v13 = vsub.f32 %v5104_v41, %v4494_v59 }
 0x97b   :  { %1948 = vmin.xlane.f32.xlu1 %v1945_v31 }
 0xa06   :  { %v1947_v7 = vpop.xlane.xlu0 %1946 }
 0xa07   :  { %vm1950_vm13 = vcmp.le.f32.partialorder %v1944_v19, %v1947_v7  ;;  %v929_v19 = vmul.f32 %v927_v30, %v927_v30  ;;  %v930_v7 = vmul.f32 %v928_v13, %v928_v13 }
 0xa08   :  { %v1952_v58 = vsel %vm1950_vm13, %v4731_v22, 128  ;;  %v1949_v49 = vpop.xlane.xlu1 %1948 }
 0xa09   :  { %vm1951_vm14 = vcmp.le.f32.partialorder %v1945_v31, %v1949_v49  ;;  %v1955_v52 = vshra.s32 %v1952_v58, 16  ;;  %v1954_v63 = vand.u32 65535, %v1952_v58  ;;  %v1808_v31 = vsub.f32 %v5513_v15, %v5114_v50 }
 0xa0a   :  { %v1953_v4 = vsel %vm1951_vm14, %v4731_v22, 128  ;;  %v1811_v49 = vmul.f32 %v1809_v47, %v1809_v47 }
 0xa0b   :  { %v1957_v54 = vcvt.s32.f32 %v1955_v52  ;;  %v1969_v42 = vshra.s32 %v1953_v4, 16  ;;  %v1968_v51 = vand.u32 65535, %v1953_v4  ;;  %v1956_v38 = vcvt.s32.f32 %v1954_v63  ;;  %v1999_v52 = vld [vmem:[#allocation5 + $0x150] sm:$0xff]  ;;  %v2000_v4 = vld [vmem:[#allocation5 + $0x158] sm:$0xff]  ;;  %v2002_v63 = vld [vmem:[#allocation5 + $0x168] sm:$0xff] }
 0xa0c   :  { %v1810_v58 = vmul.f32 %v1808_v31, %v1808_v31  ;;  %v2039_v41 = vand.u32 4294901760, %v2000_v4  ;;  %v2045_v15 = vand.u32 4294901760, %v2002_v63 }
 0xa0d   :  { %1958 = vmin.xlane.f32.xlu0 %v1957_v54  ;;  %v1971_v28 = vcvt.s32.f32 %v1969_v42  ;;  %v1970_v1 = vcvt.s32.f32 %v1968_v51  ;;  %v5626_v51 = vsub.f32 %v5532_v35, %v2009_v29 }
 0xa0e   :  { %v5647_v31 = vsub.f32 %v2000_v4, %v2039_v41 }
 0xa0f   :  { %1972 = vmin.xlane.f32.xlu1 %v1971_v28  ;;  %v6002_v59 = vand.u32 4294901760, %v5626_v51 }
 0xa10   :  { %v6007_v47 = vand.u32 4294901760, %v5647_v31 }
 0xa11   :  { %v2117_v35 = vsub.f32 %v5626_v51, %v6002_v59 }
 0xa13   :  { %v2118_v29 = vand.u32 4294901760, %v2117_v35  ;;  %v5659_v35 = vsub.f32 %v2002_v63, %v2045_v15 }
 0xa9a   :  { %v5600_v43 = vpop.xlane.xlu0 %1958 }
 0xa9b   :  { %vm1960_vm15 = vcmp.eq.f32.partialorder %v1957_v54, %v5600_v43  ;;  %v2036_v54 = vand.u32 4294901760, %v1999_v52 }
 0xa9c   :  { %v5604_v32 = vpop.xlane.xlu1 %1972  ;;  %v1961_v56 = vsel %vm1960_vm15, %v1956_v38, inf  ;;  %v2003_v38 = vld [vmem:[#allocation5 + $0x170] sm:$0xff] }
 0xa9d   :  { %1962 = vmin.xlane.f32.xlu0 %v1961_v56  ;;  %vm1974_vm0 = vcmp.eq.f32.partialorder %v1971_v28, %v5604_v32  ;;  %v5612_v42 = vpack.c.bf16 %v2039_v41, %v2036_v54  ;;  %v2001_v28 = vld [vmem:[#allocation5 + $0x160] sm:$0xff]  ;;  %v2048_v30 = vand.u32 4294901760, %v2003_v38  ;;  %v2051_v56 = vand.u32 4294901760, %v2004_v57 }
 0xa9e   :  { %v1975_v16 = vsel %vm1974_vm0, %v1970_v1, inf  ;;  %v2042_v50 = vand.u32 4294901760, %v2001_v28  ;;  %v2109_v1 = vand.u32 4294901760, %v5621_v39  ;;  %v6005_v41 = vand.u32 4294901760, %v5659_v35 }
 0xa9f   :  { %1976 = vmin.xlane.f32.xlu1 %v1975_v16  ;;  %4256 = vmatprep.subr.bf16.mxu1 %v5612_v42  ;;  %v5632_v13 = vpack.c.bf16 %v2051_v56, %v2048_v30  ;;  %v5670_v59 = vsub.f32 %v2004_v57, %v2051_v56 }
 0xaa0   :  { %4258 = vmatpush3.bf16.msra.mxu1 %v5612_v42  ;;  %v5616_v44 = vpack.c.bf16 %v2045_v15, %v2042_v50  ;;  %v2110_v11 = vsub.f32 %v5621_v39, %v2109_v1 }
 0xaa1   :  { %931 = vadd.xlane.f32.xlu0 %v929_v19  ;;  %v5645_v19 = vsub.f32 %v1999_v52, %v2036_v54  ;;  %v6003_v15 = vand.u32 4294901760, %v5670_v59 }
 0xaa2   :  { %4260 = vmatprep.subr.bf16.mxu1 %v5616_v44  ;;  %v2111_v33 = vand.u32 4294901760, %v2110_v11  ;;  %v5657_v11 = vsub.f32 %v2001_v28, %v2042_v50  ;;  %v2201_v28 = vsub.f32 %v5659_v35, %v6005_v41 }
 0xaa3   :  { %933 = vadd.xlane.f32.xlu1 %v930_v7  ;;  %v6001_v7 = vand.u32 4294901760, %v5645_v19 }
 0xaa4   :  { %4262 = vmatpush3.bf16.msra.mxu1 %v5616_v44  ;;  %v5642_v16 = vpack.c.bf16 %v2118_v29, %v2111_v33  ;;  %v6006_v4 = vand.u32 4294901760, %v5657_v11 }
 0xaa5   :  { %1812 = vadd.xlane.f32.xlu0 %v1810_v58  ;;  %4264 = vmatprep.subr.bf16.mxu1 %v5632_v13  ;;  %v2180_v58 = vsub.f32 %v5645_v19, %v6001_v7  ;;  %v5668_v7 = vsub.f32 %v2003_v38, %v2048_v30  ;;  %v2215_v38 = vsub.f32 %v5670_v59, %v6003_v15 }
 0xaa6   :  { %v2194_v29 = vsub.f32 %v5657_v11, %v6006_v4 }
 0xaa7   :  { %1814 = vadd.xlane.f32.xlu1 %v1811_v49  ;;  %v2187_v49 = vsub.f32 %v5647_v31, %v6007_v47  ;;  %v2181_v52 = vand.u32 4294901760, %v2180_v58  ;;  %v6004_v50 = vand.u32 4294901760, %v5668_v7  ;;  %v2202_v58 = vand.u32 4294901760, %v2201_v28 }
 0xaa8   :  { %4266 = vmatpush3.bf16.msra.mxu1 %v5632_v13  ;;  %v2195_v63 = vand.u32 4294901760, %v2194_v29  ;;  %v2216_v56 = vand.u32 4294901760, %v2215_v38  ;;  %v5693_v29 = vpack.c.bf16 %v5647_v31, %v5645_v19  ;;  %v5697_v28 = vpack.c.bf16 %v5659_v35, %v5657_v11 }
 0xaa9   :  { %4268 = vmatprep.subr.bf16.mxu1 %v5642_v16  ;;  %v2188_v54 = vand.u32 4294901760, %v2187_v49  ;;  %v2208_v49 = vsub.f32 %v5668_v7, %v6004_v50  ;;  %v1965_v38 = vcvt.f32.s32 %v5600_v43 }
 0xaaa   :  { %v5683_v57 = vpack.c.bf16 %v2202_v58, %v2195_v63  ;;  %v5701_v63 = vpack.c.bf16 %v5670_v59, %v5668_v7  ;;  %v5706_v58 = vsub.f32 %v5534_v25, %v2012_v5  ;;  %v5720_v25 = vsub.f32 %v5541_v10, %v2018_v0 }
 0xaab   :  { %v5663_v33 = vpack.c.bf16 %v2188_v54, %v2181_v52  ;;  %v2209_v30 = vand.u32 4294901760, %v2208_v49  ;;  %v5689_v54 = vpack.c.bf16 %v5626_v51, %v5621_v39  ;;  %v5711_v49 = vsub.f32 %v5538_v34, %v2015_v6 }
 0xaac   :  { %v2123_v15 = vand.u32 4294901760, %v5706_v58  ;;  %v1966_v41 = vshll.u32 %v1965_v38, 16  ;;  %v5725_v34 = vsub.f32 %v5543_v61, %v2021_v2  ;;  %v2707_v38 = vsel %vm2706_vm1, %v4906_v18, %v5298_v8 }
 0xaad   :  { %v5685_v52 = vpack.c.bf16 %v2216_v56, %v2209_v30  ;;  %v1979_v30 = vcvt.f32.s32 %v5604_v32  ;;  %v2130_v50 = vand.u32 4294901760, %v5711_v49  ;;  %v2708_v10 = vsel %vm2706_vm1, %v4926_v24, %v5305_v26 }
 0xaae   :  { %v2124_v0 = vsub.f32 %v5706_v58, %v2123_v15  ;;  %v6008_v8 = vand.u32 4294901760, %v5725_v34  ;;  %v5756_v26 = vsub.f32 %v5560_v17, %v2024_v45  ;;  %v6031_v39 = vand.u32 4294901760, %v5720_v25 }
 0xaaf   :  { %v1980_v6 = vshll.u32 %v1979_v30, 16  ;;  %v2131_v61 = vsub.f32 %v5711_v49, %v2130_v50 }
 0xb2a   :  { %v1963_v56 = vpop.xlane.xlu0 %1962 }
 0xb2b   :  { %v1964_v4 = vcvt.f32.s32 %v1963_v56 }
 0xb2c   :  { %v1977_v5 = vpop.xlane.xlu1 %1976 }
 0xb2d   :  { %v5727_v43 = vadd.s32 %v1966_v41, %v1964_v4  ;;  %v1978_v32 = vcvt.f32.s32 %v1977_v5  ;;  %v6009_v4 = vand.u32 4294901760, %v5720_v25  ;;  %v5761_v41 = vsub.f32 %v5562_v40, %v2027_v36 }
 0xb2e   :  { %v2125_v36 = vand.u32 4294901760, %v2124_v0  ;;  %v2132_v5 = vand.u32 4294901760, %v2131_v61  ;;  %v5799_v0 = vsub.f32 %v5575_v21, %v2030_v23  ;;  %v5804_v61 = vsub.f32 %v5577_v9, %v2033_v60 }
 0xb2f   :  { %vm1982_vm4 = vcmp.eq.s32.totalorder %v4731_v22, %v5727_v43  ;;  %v5743_v2 = vadd.s32 %v1980_v6, %v1978_v32  ;;  %v2710_v18 = vsel %vm2709_vm2, %v2707_v38, %v5727_v43  ;;  %v2138_v6 = vsub.f32 %v5720_v25, %v6009_v4 }
 0xb30   :  { %v2802_v24 = vsel %vm1982_vm4, 1.0, %v6029_v27  ;;  %2713 = vst.msk [vmem:[%s5978_s5] sm:$0xff] %vm2712_vm3, %v2710_v18  ;;  %v2145_v32 = vsub.f32 %v5725_v34, %v6008_v8  ;;  %v2158_v38 = vand.u32 4294901760, %v5761_v41  ;;  %v2165_v9 = vand.u32 4294901760, %v5799_v0 }
 0xb31   :  { %v5767_v30 = vsub.f32 %v2802_v24, %v2802_v24  ;;  %vm1983_vm5 = vcmp.eq.s32.totalorder %v4731_v22, %v5743_v2  ;;  %v2711_v56 = vsel %vm2709_vm2, %v2708_v10, %v5743_v2  ;;  %v2139_v47 = vand.u32 4294901760, %v2138_v6 }
 0xb32   :  { %v2803_v17 = vsel %vm1983_vm5, 1.0, %v6029_v27  ;;  %2714 = vst.msk [vmem:[%s5978_s5 + $0x8] sm:$0xff] %vm2712_vm3, %v2711_v56  ;;  %v2151_v27 = vand.u32 4294901760, %v5756_v26  ;;  %v2146_v8 = vand.u32 4294901760, %v2145_v32  ;;  %v2159_v23 = vsub.f32 %v5761_v41, %v2158_v38  ;;  %s4623_s5 = smov [#allocation8]  }
 0xb33   :  { %v5781_v40 = vsub.f32 %v2803_v17, %v2803_v17  ;;  %v2088_v45 = vand.u32 4294901760, %v5767_v30  ;;  %v4271_v17 = vpack.c.bf16 %v2132_v5, %v2125_v36  ;;  %v2172_v60 = vand.u32 4294901760, %v5804_v61  ;;  %s2726_s1 = sshll.u32 %s4623_s5, 4  ;;  %s2727_s1 = int_to_ptr.vmem [resolvable:$true] %s2726_s1 }
 0xb34   :  { %v2152_v4 = vsub.f32 %v5756_v26, %v2151_v27  ;;  %v4275_v36 = vpack.c.bf16 %v2146_v8, %v2139_v47  ;;  %v2160_v6 = vand.u32 4294901760, %v2159_v23  ;;  %v2166_v32 = vsub.f32 %v5799_v0, %v2165_v9  ;;  %s4561_s21 = scalar_lea.vmem %s2727_s1, 256  ;;  %p4566_p11 = scmp.lt.s32.totalorder %s2727_s1, %s2727_s1 }
 0xb35   :  { %v2089_v10 = vsub.f32 %v5767_v30, %v2088_v45  ;;  %v2098_v18 = vand.u32 4294901760, %v5781_v40  ;;  %v4303_v47 = vpack.c.bf16 %v5711_v49, %v5706_v58  ;;  %v6034_v58 = vand.u32 4294901760, %v5647_v31  ;;  %p4562_p10 = scmp.ne.s32.totalorder %s2727_s1, %s4561_s21  ;;  %p4567_p12 = scmp.lt.s32.totalorder %s4561_s21, %s4561_s21 }
 0xb36   :  { %v2153_v5 = vand.u32 4294901760, %v2152_v4  ;;  %v6037_v8 = vand.u32 4294901760, %v5668_v7 }
 0xb37   :  { %v2090_v24 = vand.u32 4294901760, %v2089_v10  ;;  %v2099_v56 = vsub.f32 %v5781_v40, %v2098_v18  ;;  %v2173_v10 = vsub.f32 %v5804_v61, %v2172_v60  ;;  %p4568_p13 = por %p4567_p12, %p4566_p11 }
 0xb39   :  { %3673 = vmatprep.mubr.f32.mxu1 %v2090_v24  ;;  %v2100_v21 = vand.u32 4294901760, %v2099_v56  ;;  %v2167_v24 = vand.u32 4294901760, %v2166_v32  ;;  %v2174_v56 = vand.u32 4294901760, %v2173_v10  ;;  %p4569_p0 = pnand %p4568_p13, %p4562_p10 }
 0xb3b   :  { %3674 = vmatmul.mubr.f32.vlgmr.msra.gmra.mrb[2].mxu1 %v2100_v21  ;;  %v4283_v21 = vpack.c.bf16 %v2174_v56, %v2167_v24 }
 0xb3c   :  { %4270 = vmatpush3.bf16.msra.mxu1 %v5642_v16  ;;  %3708 = vmatprep.mubr.msk.f32.mxu1 %vm1982_vm4, %v4622_v48  ;;  %v4279_v16 = vpack.c.bf16 %v2160_v6, %v2153_v5 }
 0xb3d   :  { %4272 = vmatprep.subr.bf16.mxu1 %v4271_v17 }
 0xb40   :  { %4274 = vmatpush3.bf16.msra.mxu1 %v4271_v17 }
 0xb41   :  { %4276 = vmatprep.subr.bf16.mxu1 %v4275_v36 }
 0xb44   :  { %4278 = vmatpush3.bf16.msra.mxu1 %v4275_v36 }
 0xb45   :  { %4280 = vmatprep.subr.bf16.mxu1 %v4279_v16 }
 0xb48   :  { %4282 = vmatpush3.bf16.msra.mxu1 %v4279_v16 }
 0xb49   :  { %4284 = vmatprep.subr.bf16.mxu1 %v4283_v21 }
 0xb4c   :  { %4286 = vmatpush3.bf16.msra.mxu1 %v4283_v21 }
 0xb4d   :  { %4288 = vmatprep.subr.bf16.mxu1 %v5663_v33 }
 0xb50   :  { %4290 = vmatpush3.bf16.msra.mxu1 %v5663_v33  ;;  %v4307_v33 = vpack.c.bf16 %v5725_v34, %v5720_v25  ;;  %v6035_v25 = vand.u32 4294901760, %v5657_v11 }
 0xb51   :  { %4292 = vmatprep.subr.bf16.mxu1 %v5683_v57 }
 0xb54   :  { %4294 = vmatpush3.bf16.msra.mxu1 %v5683_v57  ;;  %v4311_v57 = vpack.c.bf16 %v5761_v41, %v5756_v26  ;;  %v6038_v26 = vand.u32 4294901760, %v5670_v59 }
 0xb55   :  { %4296 = vmatprep.subr.bf16.mxu1 %v5685_v52 }
 0xb56   :  { %v4391_v41 = vpack.c.bf16 %v6038_v26, %v6037_v8 }
 0xb58   :  { %4298 = vmatpush3.bf16.msra.mxu1 %v5685_v52  ;;  %v4315_v52 = vpack.c.bf16 %v5804_v61, %v5799_v0 }
 0xb59   :  { %4300 = vmatprep.subr.bf16.mxu1 %v5689_v54 }
 0xb5b   :  { %3709 = vmatmul.mubr.msk.f32.vlgmr.msra.gmra.mrb[2].mxu1 %vm1983_vm5, %v4622_v48 }
 0xb5c   :  { %4302 = vmatpush3.bf16.msra.mxu1 %v5689_v54  ;;  %3743 = vmatprep.mubr.f32.mxu1 %v5767_v30  ;;  %v6030_v54 = vand.u32 4294901760, %v5626_v51  ;;  %v6032_v51 = vand.u32 4294901760, %v5725_v34  ;;  %v6036_v34 = vand.u32 4294901760, %v5659_v35 }
 0xb5d   :  { %4304 = vmatprep.subr.bf16.mxu1 %v4303_v47 }
 0xb5e   :  { %v4387_v4 = vpack.c.bf16 %v6036_v34, %v6035_v25 }
 0xb60   :  { %4306 = vmatpush3.bf16.msra.mxu1 %v4303_v47 }
 0xb61   :  { %4308 = vmatprep.subr.bf16.mxu1 %v4307_v33 }
 0xb64   :  { %4310 = vmatpush3.bf16.msra.mxu1 %v4307_v33 }
 0xb65   :  { %4312 = vmatprep.subr.bf16.mxu1 %v4311_v57 }
 0xb68   :  { %4314 = vmatpush3.bf16.msra.mxu1 %v4311_v57 }
 0xb69   :  { %4316 = vmatprep.subr.bf16.mxu1 %v4315_v52 }
 0xb6c   :  { %4318 = vmatpush3.bf16.msra.mxu1 %v4315_v52 }
 0xb6d   :  { %4320 = vmatprep.subr.bf16.mxu1 %v5693_v29 }
 0xb70   :  { %4322 = vmatpush3.bf16.msra.mxu1 %v5693_v29  ;;  %v4363_v29 = vpack.c.bf16 %v6030_v54, %v2109_v1  ;;  %v4371_v1 = vpack.c.bf16 %v6032_v51, %v6031_v39 }
 0xb71   :  { %4324 = vmatprep.subr.bf16.mxu1 %v5697_v28 }
 0xb74   :  { %4326 = vmatpush3.bf16.msra.mxu1 %v5697_v28  ;;  %v4367_v28 = vpack.c.bf16 %v2130_v50, %v2123_v15  ;;  %v4375_v50 = vpack.c.bf16 %v2158_v38, %v2151_v27  ;;  %v4379_v15 = vpack.c.bf16 %v2172_v60, %v2165_v9 }
 0xb75   :  { %4328 = vmatprep.subr.bf16.mxu1 %v5701_v63 }
 0xb78   :  { %4330 = vmatpush3.bf16.msra.mxu1 %v5701_v63  ;;  %v6033_v63 = vand.u32 4294901760, %v5645_v19 }
 0xb79   :  { %4332 = vmatprep.subr.bf16.mxu1 %v5550_v12 }
 0xb7a   :  { %v4383_v49 = vpack.c.bf16 %v6034_v58, %v6033_v63 }
 0xb7b   :  { %3744 = vmatmul.mubr.f32.vlgmr.msra.gmra.mrb[2].mxu1 %v5781_v40 }
 0xb7c   :  { %4334 = vmatpush3.bf16.msra.mxu1 %v5550_v12  ;;  %3778 = vmatprep.mubr.f32.mxu1 %v2088_v45 }
 0xb7d   :  { %4336 = vmatprep.subr.bf16.mxu1 %v5558_v62 }
 0xb80   :  { %4338 = vmatpush3.bf16.msra.mxu1 %v5558_v62 }
 0xb81   :  { %4340 = vmatprep.subr.bf16.mxu1 %v5571_v20 }
 0xb84   :  { %4342 = vmatpush3.bf16.msra.mxu1 %v5571_v20 }
 0xb85   :  { %4344 = vmatprep.subr.bf16.mxu1 %v5585_v55 }
 0xb88   :  { %4346 = vmatpush3.bf16.msra.mxu1 %v5585_v55 }
 0xb89   :  { %4348 = vmatprep.subr.bf16.mxu1 %v5595_v14 }
 0xb8c   :  { %4350 = vmatpush3.bf16.msra.mxu1 %v5595_v14 }
 0xb8d   :  { %4352 = vmatprep.subr.bf16.mxu1 %v5612_v42 }
 0xb90   :  { %4354 = vmatpush3.bf16.msra.mxu1 %v5612_v42 }
 0xb91   :  { %4356 = vmatprep.subr.bf16.mxu1 %v5616_v44 }
 0xb94   :  { %4358 = vmatpush3.bf16.msra.mxu1 %v5616_v44 }
 0xb95   :  { %4360 = vmatprep.subr.bf16.mxu1 %v5632_v13 }
 0xb98   :  { %4362 = vmatpush3.bf16.msra.mxu1 %v5632_v13 }
 0xb99   :  { %4364 = vmatprep.subr.bf16.mxu1 %v4363_v29 }
 0xb9b   :  { %3779 = vmatmul.mubr.f32.vlgmr.msra.gmra.mrb[2].mxu1 %v2098_v18 }
 0xb9c   :  { %4366 = vmatpush3.bf16.msra.mxu1 %v4363_v29  ;;  %3813 = vmatprep.mubr.msk.f32.mxu1 %vm1982_vm4, %v4622_v48 }
 0xb9d   :  { %4368 = vmatprep.subr.bf16.mxu1 %v4367_v28 }
 0xba0   :  { %4370 = vmatpush3.bf16.msra.mxu1 %v4367_v28 }
 0xba1   :  { %4372 = vmatprep.subr.bf16.mxu1 %v4371_v1 }
 0xba4   :  { %4374 = vmatpush3.bf16.msra.mxu1 %v4371_v1 }
 0xba5   :  { %4376 = vmatprep.subr.bf16.mxu1 %v4375_v50 }
 0xba8   :  { %4378 = vmatpush3.bf16.msra.mxu1 %v4375_v50 }
 0xba9   :  { %4380 = vmatprep.subr.bf16.mxu1 %v4379_v15 }
 0xbac   :  { %4382 = vmatpush3.bf16.msra.mxu1 %v4379_v15 }
 0xbad   :  { %4384 = vmatprep.subr.bf16.mxu1 %v4383_v49 }
 0xbb0   :  { %4386 = vmatpush3.bf16.msra.mxu1 %v4383_v49 }
 0xbb1   :  { %4388 = vmatprep.subr.bf16.mxu1 %v4387_v4 }
 0xbb4   :  { %4390 = vmatpush3.bf16.msra.mxu1 %v4387_v4 }
 0xbb5   :  { %4392 = vmatprep.subr.bf16.mxu1 %v4391_v41 }
 0xbb8   :  { %4394 = vmatpush3.bf16.msra.mxu1 %v4391_v41 }
 0xbb9   :  { %4396 = vmatprep.subr.bf16.mxu1 %v5550_v12 }
 0xbbb   :  { %3814 = vmatmul.mubr.msk.f32.vlgmr.msra.gmra.mrb[2].mxu1 %vm1983_vm5, %v4622_v48 }
 0xbbc   :  { %4398 = vmatpush3.bf16.msra.mxu1 %v5550_v12  ;;  %3848 = vmatprep.mubr.msk.f32.mxu1 %vm1982_vm4, %v4622_v48 }
 0xbbd   :  { %4400 = vmatprep.subr.bf16.mxu1 %v5558_v62 }
 0xbc0   :  { %4402 = vmatpush3.bf16.msra.mxu1 %v5558_v62 }
 0xbc1   :  { %4404 = vmatprep.subr.bf16.mxu1 %v5571_v20 }
 0xbc4   :  { %4406 = vmatpush3.bf16.msra.mxu1 %v5571_v20 }
 0xbc5   :  { %4408 = vmatprep.subr.bf16.mxu1 %v5585_v55 }
 0xbc8   :  { %4410 = vmatpush3.bf16.msra.mxu1 %v5585_v55 }
 0xbc9   :  { %4412 = vmatprep.subr.bf16.mxu1 %v5595_v14 }
 0xbcc   :  { %4414 = vmatpush3.bf16.msra.mxu1 %v5595_v14 }
 0xbcd   :  { %4416 = vmatprep.subr.bf16.mxu1 %v5612_v42 }
 0xbd0   :  { %4418 = vmatpush3.bf16.msra.mxu1 %v5612_v42 }
 0xbd1   :  { %4420 = vmatprep.subr.bf16.mxu1 %v5616_v44 }
 0xbd4   :  { %4422 = vmatpush3.bf16.msra.mxu1 %v5616_v44 }
 0xbd5   :  { %4424 = vmatprep.subr.bf16.mxu1 %v5632_v13 }
 0xbd8   :  { %4426 = vmatpush3.bf16.msra.mxu1 %v5632_v13 }
 0xbdb   :  { %3849 = vmatmul.mubr.msk.f32.vlgmr.msra.gmra.mrb[2].mxu1 %vm1983_vm5, %v4622_v48 }
 0xcae   :  { %v3850_v12 = vpop.f32.mrb[2].mxu1 }
 0xcaf   :  { %v2690_v62 = vsub.f32 %v3850_v12, %v5511_v3  ;;  %v2705_v20 = vadd.f32 %v3850_v12, %v5507_v53  ;;  %v2679_v55 = vpop.f32.mrb[3].mxu1 }
 0xcb0   :  { %v2689_v14 = vsub.f32 %v2679_v55, %v5517_v37  ;;  %v2704_v42 = vadd.f32 %v2679_v55, %v5521_v46 }
 0xcb1   :  { %2716 = vst [vmem:[#allocation8 + $0x8] sm:$0xff] %v2705_v20  ;;  %v2692_v44 = vmul.f32 %v2690_v62, %v2690_v62 }
 0xcb2   :  { %v2691_v59 = vmul.f32 %v2689_v14, %v2689_v14  ;;  %2715 = vst [vmem:[#allocation8] sm:$0xff] %v2704_v42 }
 0xcb3   :  { %2695 = vadd.xlane.f32.xlu1 %v2692_v44 }
 0xcb4   :  { %2693 = vadd.xlane.f32.xlu0 %v2691_v59 }
 0xcb5   :  { %4572 = shalt.err (!%p4569_p0)
}
 0xcb6   :  { %s4573_s25 = scalar_lea.hbm %s5977_s4, 256 }
 0xcb7   :  { %p4574_p1 = scmp.ne.s32.totalorder %s5977_s4, %s4573_s25  ;;  %p4577_p2 = scmp.lt.u32.totalorder %s4573_s25, %s5977_s4 }
 0xcb9   :  { %p4579_p3 = pnand %p4577_p2, %p4574_p1 }
 0xcbb   :  { %4582 = shalt.err (!%p4579_p3)
}
 0xcbc   :  { %2732 = dma.vmem_to_hbm [thread:$0]  %s2727_s1, 256, %s5977_s4, [#allocation4], %s4615_s9, %s4615_s9, %s4616_s10   ;;  %v934_v22 = vpop.xlane.xlu1 %933  ;;  %v932_v48 = vpop.xlane.xlu0 %931  ;;  %vm2719_vm6 = vcmask 16384  }
 0xcbd   :  { %v935_v46 = vadd.f32 %v934_v22, %v932_v48  ;;  %s4624_s4 = smov [#allocation9]  }
 0xcbe   :  { %s2741_s9 = sshll.u32 %s4624_s4, 4  ;;  %s2742_s9 = int_to_ptr.vmem [resolvable:$true] %s2741_s9 }
 0xcbf   :  { %v936_v19 = vrot.slane %v935_v46, 4  ;;  %s4583_s10 = scalar_lea.vmem %s2742_s9, 16  ;;  %s4587_s8 = scalar_lea.vmem %s2742_s9, 32 }
 0xcc0   :  { %v1815_v53 = vpop.xlane.xlu1 %1814  ;;  %v1813_v3 = vpop.xlane.xlu0 %1812  ;;  %p4584_p4 = scmp.ne.s32.totalorder %s2742_s9, %s4583_s10  ;;  %p4588_p5 = scmp.lt.s32.totalorder %s2742_s9, %s2742_s9 }
 0xcc1   :  { %v1816_v37 = vadd.f32 %v1815_v53, %v1813_v3  ;;  %v937_v7 = vadd.f32 %v936_v19, %v935_v46  ;;  %p4589_p6 = scmp.lt.s32.totalorder %s4587_s8, %s4583_s10 }
 0xcc3   :  { %v1817_v13 = vrot.slane %v1816_v37, 4  ;;  %v938_v43 = vrot.slane %v937_v7, 2  ;;  %p4590_p7 = por %p4589_p6, %p4588_p5 }
 0xcc5   :  { %v1818_v31 = vadd.f32 %v1817_v13, %v1816_v37  ;;  %v939_v27 = vadd.f32 %v938_v43, %v937_v7  ;;  %p4591_p8 = pnand %p4590_p7, %p4584_p4 }
 0xcc7   :  { %v1819_v11 = vrot.slane %v1818_v31, 2  ;;  %v940_v61 = vrot.slane %v939_v27, 1 }
 0xcc9   :  { %v1820_v40 = vadd.f32 %v1819_v11, %v1818_v31  ;;  %v941_v60 = vadd.f32 %v940_v61, %v939_v27 }
 0xccb   :  { %v1821_v18 = vrot.slane %v1820_v40, 1 }
 0xccd   :  { %v1822_v23 = vadd.f32 %v1821_v18, %v1820_v40 }
 0xccf   :  { %v2717_v5 = vsel %vm2706_vm1, %v941_v60, %v1822_v23 }
 0xd40   :  { %v2696_v35 = vpop.xlane.xlu1 %2695 }
 0xd41   :  { %v2694_v2 = vpop.xlane.xlu0 %2693 }
 0xd42   :  { %v2697_v30 = vadd.f32 %v2696_v35, %v2694_v2 }
 0xd44   :  { %v2698_v45 = vrot.slane %v2697_v30, 4 }
 0xd46   :  { %v2699_v38 = vadd.f32 %v2698_v45, %v2697_v30 }
 0xd48   :  { %v2700_v0 = vrot.slane %v2699_v38, 2 }
 0xd4a   :  { %v2701_v17 = vadd.f32 %v2700_v0, %v2699_v38 }
 0xd4c   :  { %v2702_v9 = vrot.slane %v2701_v17, 1 }
 0xd4e   :  { %v2703_v36 = vadd.f32 %v2702_v9, %v2701_v17 }
 0xd50   :  { %v2718_v6 = vsel %vm2709_vm2, %v2717_v5, %v2703_v36 }
 0xd51   :  { %2720 = vst.msk [vmem:[#allocation9] sm:$0x1] %vm2719_vm6, %v2718_v6 }
 0xd52   :  { %4594 = shalt.err (!%p4591_p8)
}
 0xd53   :  { %s4595_s11 = scalar_lea.hbm %s5979_s6, 16 }
 0xd54   :  { %p4596_p9 = scmp.ne.s32.totalorder %s5979_s6, %s4595_s11  ;;  %p4599_p10 = scmp.lt.u32.totalorder %s4595_s11, %s5979_s6 }
 0xd56   :  { %p4601_p11 = pnand %p4599_p10, %p4596_p9 }
 0xd58   :  { %4604 = shalt.err (!%p4601_p11)
}
 0xd59   :  { %2744 = dma.vmem_to_hbm [thread:$0]  %s2742_s9, 16, %s5979_s6, [#allocation10]  }
 0xd5a   :  { %4609 = dma.done.wait [#allocation4], 256  }
 0xd5b   :  { %4610 = vsyncadd [#allocation4], 4294967040 }
 0xd5c   :  { %4611 = dma.done.wait [#allocation10], 16  }
 0xd5d   :  { %4612 = vsyncadd [#allocation10], 4294967280 }
 0xd5e   :  { %2753 = vsyncpa [#allocation3], 1 }
 0xd5f   :  { %2754 = vsyncpa [#allocation6], 1 }
 0xd60   :  { %2755 = vsyncpa [#allocation4], 1 }
 0xd61   :  { %2756 = vsyncpa [#allocation10], 1 }

</bundles_post_ra>
